<compile_context>
chip_gen: v7x
topology: tpu7x:2x2x1
jax: 0.10.0
libtpu: 0.0.40
codegen_flags: <defaults>
</compile_context>

<pallas_src>
import functools

import jax
import jax.numpy as jnp
import numpy as np
from jax import lax
from jax.experimental import pallas as pl
from jax.experimental.pallas import tpu as pltpu


def _round_up(x, m):
    return (x + m - 1) // m * m


def _pick_bb(bags, n, min_steps=2, target_rows=256):
    """Bags per grid step: smallest divisor of `bags` that stacks >= target_rows
    instance rows per matmul while keeping >= min_steps grid steps (v7x has two
    TensorCores); falls back to the largest divisor that keeps >= min_steps."""
    best = 1
    for bb in range(1, bags + 1):
        if bags % bb:
            continue
        if bags >= min_steps and bags // bb < min_steps:
            continue
        best = bb
        if bb * n >= target_rows:
            break
    return best


def _bclassifier_kernel(BB, N, D, H, K, ATW, BW,
                        feats_ref, ct_ref,
                        w_lin_ref, w_qv_ref, w_fcc_ref,
                        b_lin_ref, b_qv_ref, b_fcc_ref,
                        out_ref):
    NR = BB * N

    # ---- per-instance projections: all BB bags stacked into one tall matmul ----
    feats = feats_ref[...].reshape(NR, D)                        # (BB*N, D) bf16

    # self.lin : Linear(D, D) + ReLU
    h = jnp.dot(feats, w_lin_ref[...], preferred_element_type=jnp.float32)
    h = jnp.maximum(h + b_lin_ref[...], 0.0)                     # (BB*N, D) f32

    # fused self.q / self.v (Dropout(p=0.0) == identity): h @ [w_q | w_v]
    # H == 128, so both column splits are 128-lane aligned (free views).
    qv = jnp.dot(h.astype(jnp.bfloat16), w_qv_ref[...],
                 preferred_element_type=jnp.float32) + b_qv_ref[...]
    Q = jnp.tanh(qv[:, :H])                                      # (BB*N, H)
    V = qv[:, H:H + D]                                           # (BB*N, D)

    Qb = Q.reshape(BB, N, H)
    Vb = V.reshape(BB, N, D)

    # ---- per-bag attention, computed in transposed (K, N) space ----
    # torch.sort(c, 0, descending=True)[1][0] == per-class argmax over instances
    # (lowest index on ties).  ct_ref holds c transposed to (BB, K, N), so the
    # reductions below all run over the lane axis.
    ct = ct_ref[...]                                             # (BB, K, N) f32
    n_iota = lax.broadcasted_iota(jnp.int32, (BB, K, N), 2)
    col_max = jnp.max(ct, axis=2, keepdims=True)                 # (BB, K, 1)
    idx = jnp.min(jnp.where(ct == col_max, n_iota, N),
                  axis=2, keepdims=True)                         # (BB, K, 1)
    selT = (n_iota == idx).astype(jnp.float32)                   # (BB, K, N) one-hot

    # q_max[b, k, :] = Q[b, argmax_n c[b, n, k], :]   (one-hot gather on the MXU)
    q_max = jnp.einsum('bkn,bnh->bkh', selT, Qb,
                       preferred_element_type=jnp.float32)       # (BB, K, H)

    # AT = softmax_n(q_max . Q^T / sqrt(H))  ==  A^T of the reference
    logits = jnp.einsum('bkh,bnh->bkn', q_max, Qb,
                        preferred_element_type=jnp.float32) * (H ** -0.5)
    m = jnp.max(logits, axis=2, keepdims=True)
    e = jnp.exp(logits - m)
    at = e / jnp.sum(e, axis=2, keepdims=True)                   # exact divide

    # B = A^T V
    bmat = jnp.einsum('bkn,bnd->bkd', at, Vb,
                      preferred_element_type=jnp.float32)        # (BB, K, D)

    # self.fcc : Conv1d(K, K, kernel_size=D) -> C[b, o] = sum_k B[b, k, :] @ Wk[:, o]
    cvec = b_fcc_ref[...]                                        # (1, K), broadcasts
    for k in range(K):                                           # K tiny independent dots
        cvec = cvec + jnp.dot(bmat[:, k, :], w_fcc_ref[k],
                              preferred_element_type=jnp.float32)

    # ---- output slab: [ A^T | B | C ] at lane offsets 0 / ATW / ATW+BW ----
    # All stores start on 128-lane boundaries (no rotate chain); padding lanes /
    # rows are left unwritten (the wrapper never reads them), so there is no
    # redundant full-slab zero store.
    out_ref[:, 0:K, 0:N] = at
    out_ref[:, 0:K, ATW:ATW + D] = bmat
    out_ref[:, 0:1, ATW + BW:ATW + BW + K] = cvec[:, None, :]


@jax.jit
def bclassifier_forward(feats, c, packed):
    """feats: (Bags, N, D) f32, c: (Bags, N, K) f32, packed = pack_params(...).

    Returns (C (Bags, 1, K), A (Bags, N, K), B (Bags, K, D))."""
    Bags, N, D = feats.shape
    K = c.shape[-1]
    H = packed["w_qv"].shape[1] - D
    assert H % 128 == 0, "q hidden is 128 in the module (keeps the V split lane-aligned)"
    assert N % 8 == 0, "instance count assumed padded to a sublane multiple"

    BB = _pick_bb(Bags, N)
    grid = (Bags // BB,)

    ATW = _round_up(N, 128)          # A^T region width
    BW = _round_up(D, 128)           # B region width
    CW = _round_up(K, 128)           # C region width
    slab_w = ATW + BW + CW
    R = _round_up(K, 8)              # slab rows per bag (sublane multiple)

    feats16 = feats.astype(jnp.bfloat16)
    ct = jnp.swapaxes(c, 1, 2)       # (Bags, K, N) f32 -- argmax selection stays exact

    flops = Bags * (2 * N * D * D            # lin
                    + 2 * N * D * (H + D)    # fused q/v
                    + 2 * K * N * H          # q_max gather
                    + 2 * K * N * H          # attention logits
                    + 2 * K * N * D          # B = A^T V
                    + 2 * K * D * K)         # fcc
    transcendentals = Bags * (N * H + K * N)
    bytes_accessed = (2 * Bags * N * D + 4 * Bags * K * N + 4 * Bags * R * slab_w
                      + 2 * (D * D + D * (H + D))
                      + 4 * (K * D * K + D + (H + D) + K))

    kernel = functools.partial(_bclassifier_kernel, BB, N, D, H, K, ATW, BW)

    slab = pl.pallas_call(
        kernel,
        out_shape=jax.ShapeDtypeStruct((Bags, R, slab_w), jnp.float32),
        grid_spec=pltpu.PrefetchScalarGridSpec(
            num_scalar_prefetch=0,
            grid=grid,
            in_specs=[
                pl.BlockSpec((BB, N, D), lambda b: (b, 0, 0)),       # feats (bf16)
                pl.BlockSpec((BB, K, N), lambda b: (b, 0, 0)),       # c^T   (f32)
                pl.BlockSpec((D, D), lambda b: (0, 0)),              # w_lin (resident)
                pl.BlockSpec((D, H + D), lambda b: (0, 0)),          # w_qv  (resident)
                pl.BlockSpec((K, D, K), lambda b: (0, 0, 0)),        # w_fcc (resident)
                pl.BlockSpec((1, D), lambda b: (0, 0)),              # b_lin
                pl.BlockSpec((1, H + D), lambda b: (0, 0)),          # b_qv
                pl.BlockSpec((1, K), lambda b: (0, 0)),              # b_fcc
            ],
            out_specs=pl.BlockSpec((BB, R, slab_w), lambda b: (b, 0, 0)),
        ),
        compiler_params=pltpu.CompilerParams(
            dimension_semantics=("parallel",),
            vmem_limit_bytes=32 * 1024 * 1024),
        cost_estimate=pl.CostEstimate(
            flops=flops, transcendentals=transcendentals,
            bytes_accessed=bytes_accessed),
    )(feats16, ct, packed["w_lin"], packed["w_qv"], packed["w_fcc"],
      packed["b_lin"], packed["b_qv"], packed["b_fcc"])

    A = jnp.swapaxes(slab[:, :K, :N], 1, 2)          # (Bags, N, K)
    B = slab[:, :K, ATW:ATW + D]                     # (Bags, K, D)
    C = slab[:, 0:1, ATW + BW:ATW + BW + K]          # (Bags, 1, K)
    return C, A, B


def pack_params(params):
    """One-time packing of the (in, out)-layout params into kernel operands."""
    return {
        "w_lin": params["w_lin"].astype(jnp.bfloat16),                      # (D, D)
        # Q columns first (lane 0), V columns at lane H == 128 -> aligned splits.
        "w_qv": jnp.concatenate([params["w_q"], params["w_v"]],
                                axis=1).astype(jnp.bfloat16),               # (D, H+D)
        "w_fcc": jnp.transpose(params["w_fcc"], (1, 2, 0)),                 # (K_in, D, K_out)
        "b_lin": params["b_lin"],                                           # (1, D)
        "b_qv": jnp.concatenate([params["b_q"], params["b_v"]], axis=1),    # (1, H+D)
        "b_fcc": params["b_fcc"],                                           # (1, K)
    }


def bclassifier_reference(feats, c, params):
    """Pure-JAX mirror of the PyTorch forward (single bag), f32 HIGHEST precision."""
    HP = lax.Precision.HIGHEST
    h = jnp.maximum(jnp.dot(feats, params["w_lin"], precision=HP) + params["b_lin"], 0.0)
    V = jnp.dot(h, params["w_v"], precision=HP) + params["b_v"]
    Q = jnp.tanh(jnp.dot(h, params["w_q"], precision=HP) + params["b_q"])
    idx = jnp.argmax(c, axis=0)                                   # m_indices[0, :]
    q_max = Q[idx]                                                # q(h[idx])
    A = jnp.dot(Q, q_max.T, precision=HP) / jnp.sqrt(jnp.float32(Q.shape[1]))
    A = jax.nn.softmax(A, axis=0)
    B = jnp.dot(A.T, V, precision=HP)                             # (K, D)
    C = jnp.einsum("okd,kd->o", params["w_fcc"], B, precision=HP) + params["b_fcc"][0]
    return C[None, :], A, B


def init_params(key, D, K, H):
    ks = jax.random.split(key, 8)
    s = 0.1
    w_fcc = s * jax.random.normal(ks[6], (K, K, D), jnp.float32)  # torch (out, in, ksize)
    return {
        "w_lin": s * jax.random.normal(ks[0], (D, D), jnp.float32),
        "b_lin": s * jax.random.normal(ks[1], (1, D), jnp.float32),
        "w_q":   s * jax.random.normal(ks[2], (D, H), jnp.float32),
        "b_q":   s * jax.random.normal(ks[3], (1, H), jnp.float32),
        "w_v":   s * jax.random.normal(ks[4], (D, D), jnp.float32),
        "b_v":   s * jax.random.normal(ks[5], (1, D), jnp.float32),
        "w_fcc": w_fcc,
        "b_fcc": s * jax.random.normal(ks[7], (1, K), jnp.float32),
    }


if __name__ == "__main__":
    # bags, instances/bag, input_size, output_class, q hidden (fixed to 128 by the module)
    Bags, N, D, K, H = 32, 16, 32, 4, 128

    key = jax.random.PRNGKey(0)
    k_feat, k_c, k_par = jax.random.split(key, 3)
    feats = jax.random.normal(k_feat, (Bags, N, D), jnp.float32)
    c = jax.random.normal(k_c, (Bags, N, K), jnp.float32)
    params = init_params(k_par, D, K, H)
    packed = pack_params(params)

    C_out, A_out, B_out = jax.block_until_ready(
        bclassifier_forward(feats, c, packed))

    # Reference (vmapped over bags), f32 HIGHEST precision.
    C_ref, A_ref, B_ref = jax.vmap(
        lambda f, cc: bclassifier_reference(f, cc, params))(feats, c)

    # Kernel runs feats / w_lin / w_qv in bf16 (f32 accumulation) and the tiny
    # attention dots at default MXU precision -> loosened tolerances vs the
    # f32 HIGHEST reference.
    np.testing.assert_allclose(np.asarray(C_out), np.asarray(C_ref), rtol=2e-2, atol=2e-2)
    np.testing.assert_allclose(np.asarray(A_out), np.asarray(A_ref), rtol=2e-2, atol=2e-2)
    np.testing.assert_allclose(np.asarray(B_out), np.asarray(B_ref), rtol=2e-2, atol=2e-2)

    print("KERNEL_OK")
</pallas_src>

<mosaic_0001>
module attributes {stable_mosaic.version = 11 : i64} {
  func.func @_bclassifier_kernel(%arg0: i32, %arg1: memref<16x16x32xbf16, #tpu.memory_space<vmem>>, %arg2: memref<16x4x16xf32, #tpu.memory_space<vmem>>, %arg3: memref<32x32xbf16, #tpu.memory_space<vmem>>, %arg4: memref<32x160xbf16, #tpu.memory_space<vmem>>, %arg5: memref<4x32x4xf32, #tpu.memory_space<vmem>>, %arg6: memref<1x32xf32, #tpu.memory_space<vmem>>, %arg7: memref<1x160xf32, #tpu.memory_space<vmem>>, %arg8: memref<1x4xf32, #tpu.memory_space<vmem>>, %arg9: memref<16x8x384xf32, #tpu.memory_space<vmem>>) attributes {dimension_semantics = [#tpu.dimension_semantics<parallel>], iteration_bounds = array<i64: 2>, scalar_prefetch = 0 : i64, scratch_operands = 0 : i64, tpu.core_type = #tpu.core_type<tc>, window_params = [{transform_indices = @transform_0, window_bounds = array<i64: 16, 16, 32>}, {transform_indices = @transform_1, window_bounds = array<i64: 16, 4, 16>}, {pipeline_mode = #tpu.pipeline_mode<synchronous>, transform_indices = @transform_2, window_bounds = array<i64: 32, 32>}, {pipeline_mode = #tpu.pipeline_mode<synchronous>, transform_indices = @transform_3, window_bounds = array<i64: 32, 160>}, {pipeline_mode = #tpu.pipeline_mode<synchronous>, transform_indices = @transform_4, window_bounds = array<i64: 4, 32, 4>}, {pipeline_mode = #tpu.pipeline_mode<synchronous>, transform_indices = @transform_5, window_bounds = array<i64: 1, 32>}, {pipeline_mode = #tpu.pipeline_mode<synchronous>, transform_indices = @transform_6, window_bounds = array<i64: 1, 160>}, {pipeline_mode = #tpu.pipeline_mode<synchronous>, transform_indices = @transform_7, window_bounds = array<i64: 1, 4>}, {transform_indices = @transform_8, window_bounds = array<i64: 16, 8, 384>}]} {
    %c0 = arith.constant 0 : index
    %c0_0 = arith.constant 0 : index
    %c0_1 = arith.constant 0 : index
    %0 = vector.load %arg1[%c0, %c0_0, %c0_1] : memref<16x16x32xbf16, #tpu.memory_space<vmem>>, vector<16x16x32xbf16>
    %1 = vector.shape_cast %0 : vector<16x16x32xbf16> to vector<256x32xbf16>
    %c0_2 = arith.constant 0 : index
    %c0_3 = arith.constant 0 : index
    %2 = vector.load %arg3[%c0_2, %c0_3] : memref<32x32xbf16, #tpu.memory_space<vmem>>, vector<32x32xbf16>
    %cst = arith.constant dense<0.000000e+00> : vector<256x32xf32>
    %3 = tpu.matmul %1, %2, %cst {dimension_numbers = #tpu.dot_dimension_numbers<[1], [0], [0], [1], [0, 0, 1, 1], [], []>} : vector<256x32xbf16>, vector<32x32xbf16>, vector<256x32xf32> -> vector<256x32xf32>
    %c0_4 = arith.constant 0 : index
    %c0_5 = arith.constant 0 : index
    %4 = vector.load %arg6[%c0_4, %c0_5] : memref<1x32xf32, #tpu.memory_space<vmem>>, vector<1x32xf32>
    %5 = vector.broadcast %4 : vector<1x32xf32> to vector<256x32xf32>
    %6 = arith.addf %3, %5 : vector<256x32xf32>
    %cst_6 = arith.constant 0.000000e+00 : f32
    %7 = vector.broadcast %cst_6 : f32 to vector<256x32xf32>
    %8 = arith.maximumf %6, %7 : vector<256x32xf32>
    %9 = arith.truncf %8 : vector<256x32xf32> to vector<256x32xbf16>
    %c0_7 = arith.constant 0 : index
    %c0_8 = arith.constant 0 : index
    %10 = vector.load %arg4[%c0_7, %c0_8] : memref<32x160xbf16, #tpu.memory_space<vmem>>, vector<32x160xbf16>
    %cst_9 = arith.constant dense<0.000000e+00> : vector<256x160xf32>
    %11 = tpu.matmul %9, %10, %cst_9 {dimension_numbers = #tpu.dot_dimension_numbers<[1], [0], [0], [1], [0, 0, 1, 1], [], []>} : vector<256x32xbf16>, vector<32x160xbf16>, vector<256x160xf32> -> vector<256x160xf32>
    %c0_10 = arith.constant 0 : index
    %c0_11 = arith.constant 0 : index
    %12 = vector.load %arg7[%c0_10, %c0_11] : memref<1x160xf32, #tpu.memory_space<vmem>>, vector<1x160xf32>
    %13 = vector.broadcast %12 : vector<1x160xf32> to vector<256x160xf32>
    %14 = arith.addf %11, %13 : vector<256x160xf32>
    %15 = vector.extract_strided_slice %14 {offsets = [0, 0], sizes = [256, 128], strides = [1, 1]} : vector<256x160xf32> to vector<256x128xf32>
    %16 = math.tanh %15 : vector<256x128xf32>
    %17 = vector.extract_strided_slice %14 {offsets = [0, 128], sizes = [256, 32], strides = [1, 1]} : vector<256x160xf32> to vector<256x32xf32>
    %18 = vector.shape_cast %16 : vector<256x128xf32> to vector<16x16x128xf32>
    %19 = vector.shape_cast %17 : vector<256x32xf32> to vector<16x16x32xf32>
    %c0_12 = arith.constant 0 : index
    %c0_13 = arith.constant 0 : index
    %c0_14 = arith.constant 0 : index
    %20 = vector.load %arg2[%c0_12, %c0_13, %c0_14] : memref<16x4x16xf32, #tpu.memory_space<vmem>>, vector<16x4x16xf32>
    %21 = tpu.iota {dimensions = array<i32: 2>} : vector<16x4x16xi32>
    %cst_15 = arith.constant dense<0xFF800000> : vector<16x4xf32>
    %22 = vector.multi_reduction <maximumf>, %20, %cst_15 [2] : vector<16x4x16xf32> to vector<16x4xf32>
    %23 = vector.shape_cast %22 : vector<16x4xf32> to vector<16x4x1xf32>
    %24 = vector.broadcast %23 : vector<16x4x1xf32> to vector<16x4x16xf32>
    %25 = arith.cmpf oeq, %20, %24 : vector<16x4x16xf32>
    %c16_i32 = arith.constant 16 : i32
    %26 = vector.broadcast %c16_i32 : i32 to vector<16x4x16xi32>
    %27 = arith.select %25, %21, %26 : vector<16x4x16xi1>, vector<16x4x16xi32>
    %cst_16 = arith.constant dense<2147483647> : vector<16x4xi32>
    %28 = vector.multi_reduction <minsi>, %27, %cst_16 [2] : vector<16x4x16xi32> to vector<16x4xi32>
    %29 = vector.shape_cast %28 : vector<16x4xi32> to vector<16x4x1xi32>
    %30 = vector.broadcast %29 : vector<16x4x1xi32> to vector<16x4x16xi32>
    %31 = arith.cmpi eq, %21, %30 : vector<16x4x16xi32>
    %32 = arith.extui %31 : vector<16x4x16xi1> to vector<16x4x16xi32>
    %33 = arith.sitofp %32 : vector<16x4x16xi32> to vector<16x4x16xf32>
    "tpu.trace_start"() <{level = 10 : i32, message = "bkn,bnh->bkh"}> : () -> ()
    %cst_17 = arith.constant dense<0.000000e+00> : vector<16x4x128xf32>
    %34 = tpu.matmul %33, %18, %cst_17 {dimension_numbers = #tpu.dot_dimension_numbers<[2], [1], [1], [2], [0, 0, 0, 1, 1, 2], [0], [0]>} : vector<16x4x16xf32>, vector<16x16x128xf32>, vector<16x4x128xf32> -> vector<16x4x128xf32>
    "tpu.trace_stop"() : () -> ()
    "tpu.trace_start"() <{level = 10 : i32, message = "bkh,bnh->bkn"}> : () -> ()
    %cst_18 = arith.constant dense<0.000000e+00> : vector<16x4x16xf32>
    %35 = tpu.matmul %34, %18, %cst_18 {dimension_numbers = #tpu.dot_dimension_numbers<[2], [2], [1], [1], [0, 0, 0, 1, 1, 1], [0], [0]>} : vector<16x4x128xf32>, vector<16x16x128xf32>, vector<16x4x16xf32> -> vector<16x4x16xf32>
    "tpu.trace_stop"() : () -> ()
    %cst_19 = arith.constant 0.0883883461 : f32
    %36 = vector.broadcast %cst_19 : f32 to vector<16x4x16xf32>
    %37 = arith.mulf %35, %36 : vector<16x4x16xf32>
    %cst_20 = arith.constant dense<0xFF800000> : vector<16x4xf32>
    %38 = vector.multi_reduction <maximumf>, %37, %cst_20 [2] : vector<16x4x16xf32> to vector<16x4xf32>
    %39 = vector.shape_cast %38 : vector<16x4xf32> to vector<16x4x1xf32>
    %40 = vector.broadcast %39 : vector<16x4x1xf32> to vector<16x4x16xf32>
    %41 = arith.subf %37, %40 : vector<16x4x16xf32>
    %42 = math.exp %41 : vector<16x4x16xf32>
    %cst_21 = arith.constant dense<0.000000e+00> : vector<16x4xf32>
    %43 = vector.multi_reduction <add>, %42, %cst_21 [2] : vector<16x4x16xf32> to vector<16x4xf32>
    %44 = vector.shape_cast %43 : vector<16x4xf32> to vector<16x4x1xf32>
    %45 = vector.broadcast %44 : vector<16x4x1xf32> to vector<16x4x16xf32>
    %46 = arith.divf %42, %45 : vector<16x4x16xf32>
    "tpu.trace_start"() <{level = 10 : i32, message = "bkn,bnd->bkd"}> : () -> ()
    %cst_22 = arith.constant dense<0.000000e+00> : vector<16x4x32xf32>
    %47 = tpu.matmul %46, %19, %cst_22 {dimension_numbers = #tpu.dot_dimension_numbers<[2], [1], [1], [2], [0, 0, 0, 1, 1, 2], [0], [0]>} : vector<16x4x16xf32>, vector<16x16x32xf32>, vector<16x4x32xf32> -> vector<16x4x32xf32>
    "tpu.trace_stop"() : () -> ()
    %c0_23 = arith.constant 0 : index
    %c0_24 = arith.constant 0 : index
    %48 = vector.load %arg8[%c0_23, %c0_24] : memref<1x4xf32, #tpu.memory_space<vmem>>, vector<1x4xf32>
    %49 = vector.extract_strided_slice %47 {offsets = [0, 0, 0], sizes = [16, 1, 32], strides = [1, 1, 1]} : vector<16x4x32xf32> to vector<16x1x32xf32>
    %50 = vector.shape_cast %49 : vector<16x1x32xf32> to vector<16x32xf32>
    %c0_25 = arith.constant 0 : index
    %c0_26 = arith.constant 0 : index
    %c0_27 = arith.constant 0 : index
    %51 = vector.load %arg5[%c0_25, %c0_26, %c0_27] : memref<4x32x4xf32, #tpu.memory_space<vmem>>, vector<1x32x4xf32>
    %52 = vector.shape_cast %51 : vector<1x32x4xf32> to vector<32x4xf32>
    %cst_28 = arith.constant dense<0.000000e+00> : vector<16x4xf32>
    %53 = tpu.matmul %50, %52, %cst_28 {dimension_numbers = #tpu.dot_dimension_numbers<[1], [0], [0], [1], [0, 0, 1, 1], [], []>} : vector<16x32xf32>, vector<32x4xf32>, vector<16x4xf32> -> vector<16x4xf32>
    %54 = vector.broadcast %48 : vector<1x4xf32> to vector<16x4xf32>
    %55 = arith.addf %54, %53 : vector<16x4xf32>
    %56 = vector.extract_strided_slice %47 {offsets = [0, 1, 0], sizes = [16, 1, 32], strides = [1, 1, 1]} : vector<16x4x32xf32> to vector<16x1x32xf32>
    %57 = vector.shape_cast %56 : vector<16x1x32xf32> to vector<16x32xf32>
    %c1 = arith.constant 1 : index
    %c0_29 = arith.constant 0 : index
    %c0_30 = arith.constant 0 : index
    %58 = vector.load %arg5[%c1, %c0_29, %c0_30] : memref<4x32x4xf32, #tpu.memory_space<vmem>>, vector<1x32x4xf32>
    %59 = vector.shape_cast %58 : vector<1x32x4xf32> to vector<32x4xf32>
    %cst_31 = arith.constant dense<0.000000e+00> : vector<16x4xf32>
    %60 = tpu.matmul %57, %59, %cst_31 {dimension_numbers = #tpu.dot_dimension_numbers<[1], [0], [0], [1], [0, 0, 1, 1], [], []>} : vector<16x32xf32>, vector<32x4xf32>, vector<16x4xf32> -> vector<16x4xf32>
    %61 = arith.addf %55, %60 : vector<16x4xf32>
    %62 = vector.extract_strided_slice %47 {offsets = [0, 2, 0], sizes = [16, 1, 32], strides = [1, 1, 1]} : vector<16x4x32xf32> to vector<16x1x32xf32>
    %63 = vector.shape_cast %62 : vector<16x1x32xf32> to vector<16x32xf32>
    %c2 = arith.constant 2 : index
    %c0_32 = arith.constant 0 : index
    %c0_33 = arith.constant 0 : index
    %64 = vector.load %arg5[%c2, %c0_32, %c0_33] : memref<4x32x4xf32, #tpu.memory_space<vmem>>, vector<1x32x4xf32>
    %65 = vector.shape_cast %64 : vector<1x32x4xf32> to vector<32x4xf32>
    %cst_34 = arith.constant dense<0.000000e+00> : vector<16x4xf32>
    %66 = tpu.matmul %63, %65, %cst_34 {dimension_numbers = #tpu.dot_dimension_numbers<[1], [0], [0], [1], [0, 0, 1, 1], [], []>} : vector<16x32xf32>, vector<32x4xf32>, vector<16x4xf32> -> vector<16x4xf32>
    %67 = arith.addf %61, %66 : vector<16x4xf32>
    %68 = vector.extract_strided_slice %47 {offsets = [0, 3, 0], sizes = [16, 1, 32], strides = [1, 1, 1]} : vector<16x4x32xf32> to vector<16x1x32xf32>
    %69 = vector.shape_cast %68 : vector<16x1x32xf32> to vector<16x32xf32>
    %c3 = arith.constant 3 : index
    %c0_35 = arith.constant 0 : index
    %c0_36 = arith.constant 0 : index
    %70 = vector.load %arg5[%c3, %c0_35, %c0_36] : memref<4x32x4xf32, #tpu.memory_space<vmem>>, vector<1x32x4xf32>
    %71 = vector.shape_cast %70 : vector<1x32x4xf32> to vector<32x4xf32>
    %cst_37 = arith.constant dense<0.000000e+00> : vector<16x4xf32>
    %72 = tpu.matmul %69, %71, %cst_37 {dimension_numbers = #tpu.dot_dimension_numbers<[1], [0], [0], [1], [0, 0, 1, 1], [], []>} : vector<16x32xf32>, vector<32x4xf32>, vector<16x4xf32> -> vector<16x4xf32>
    %73 = arith.addf %67, %72 : vector<16x4xf32>
    %c0_38 = arith.constant 0 : index
    %c0_39 = arith.constant 0 : index
    %c0_40 = arith.constant 0 : index
    %74 = vector.load %arg9[%c0_38, %c0_39, %c0_40] : memref<16x8x384xf32, #tpu.memory_space<vmem>>, vector<16x4x16xf32>
    tpu.vector_store %arg9[%c0_38, %c0_39, %c0_40], %46 {strides = array<i32>} : memref<16x8x384xf32, #tpu.memory_space<vmem>>, vector<16x4x16xf32>,
    %c0_41 = arith.constant 0 : index
    %c0_42 = arith.constant 0 : index
    %c128 = arith.constant 128 : index
    %75 = vector.load %arg9[%c0_41, %c0_42, %c128] : memref<16x8x384xf32, #tpu.memory_space<vmem>>, vector<16x4x32xf32>
    tpu.vector_store %arg9[%c0_41, %c0_42, %c128], %47 {strides = array<i32>} : memref<16x8x384xf32, #tpu.memory_space<vmem>>, vector<16x4x32xf32>,
    %76 = vector.shape_cast %73 : vector<16x4xf32> to vector<16x1x4xf32>
    %c0_43 = arith.constant 0 : index
    %c0_44 = arith.constant 0 : index
    %c256 = arith.constant 256 : index
    %77 = vector.load %arg9[%c0_43, %c0_44, %c256] : memref<16x8x384xf32, #tpu.memory_space<vmem>>, vector<16x1x4xf32>
    tpu.vector_store %arg9[%c0_43, %c0_44, %c256], %76 {strides = array<i32>} : memref<16x8x384xf32, #tpu.memory_space<vmem>>, vector<16x1x4xf32>,
    return
  }
  func.func @transform_0(%arg0: i32) -> (i32, i32, i32) {
    %c0_i32 = arith.constant 0 : i32
    %c0_i32_0 = arith.constant 0 : i32
    %c0_i32_1 = arith.constant 0 : i32
    return %arg0, %c0_i32, %c0_i32_0 : i32, i32, i32
  }
  func.func @transform_1(%arg0: i32) -> (i32, i32, i32) {
    %c0_i32 = arith.constant 0 : i32
    %c0_i32_0 = arith.constant 0 : i32
    %c0_i32_1 = arith.constant 0 : i32
    return %arg0, %c0_i32, %c0_i32_0 : i32, i32, i32
  }
  func.func @transform_2(%arg0: i32) -> (i32, i32) {
    %c0_i32 = arith.constant 0 : i32
    %c0_i32_0 = arith.constant 0 : i32
    %c0_i32_1 = arith.constant 0 : i32
    return %c0_i32, %c0_i32_0 : i32, i32
  }
  func.func @transform_3(%arg0: i32) -> (i32, i32) {
    %c0_i32 = arith.constant 0 : i32
    %c0_i32_0 = arith.constant 0 : i32
    %c0_i32_1 = arith.constant 0 : i32
    return %c0_i32, %c0_i32_0 : i32, i32
  }
  func.func @transform_4(%arg0: i32) -> (i32, i32, i32) {
    %c0_i32 = arith.constant 0 : i32
    %c0_i32_0 = arith.constant 0 : i32
    %c0_i32_1 = arith.constant 0 : i32
    %c0_i32_2 = arith.constant 0 : i32
    return %c0_i32, %c0_i32_0, %c0_i32_1 : i32, i32, i32
  }
  func.func @transform_5(%arg0: i32) -> (i32, i32) {
    %c0_i32 = arith.constant 0 : i32
    %c0_i32_0 = arith.constant 0 : i32
    %c0_i32_1 = arith.constant 0 : i32
    return %c0_i32, %c0_i32_0 : i32, i32
  }
  func.func @transform_6(%arg0: i32) -> (i32, i32) {
    %c0_i32 = arith.constant 0 : i32
    %c0_i32_0 = arith.constant 0 : i32
    %c0_i32_1 = arith.constant 0 : i32
    return %c0_i32, %c0_i32_0 : i32, i32
  }
  func.func @transform_7(%arg0: i32) -> (i32, i32) {
    %c0_i32 = arith.constant 0 : i32
    %c0_i32_0 = arith.constant 0 : i32
    %c0_i32_1 = arith.constant 0 : i32
    return %c0_i32, %c0_i32_0 : i32, i32
  }
  func.func @transform_8(%arg0: i32) -> (i32, i32, i32) {
    %c0_i32 = arith.constant 0 : i32
    %c0_i32_0 = arith.constant 0 : i32
    %c0_i32_1 = arith.constant 0 : i32
    return %arg0, %c0_i32, %c0_i32_0 : i32, i32, i32
  }
}

</mosaic_0001>

<bundles_post_ra>
// kernel: bclassifier_forward.1
= control target key start
LH: loop header
LB: loop body
LE: loop exit
PB: predicated region body
PF: predicated region fallthrough
CT: control target
= control target key end

     0   :  { %s6949_s27 = smov 0   ;;  %s8310_s0 = inlined_call_operand.vmem [shape: bf16[32,16,32], index: 0, kind: input, shape index: {}]   ;;  %s8311_s1 = inlined_call_operand.vmem [shape: f32[32,4,16], index: 1, kind: input, shape index: {}]   ;;  %s8312_s2 = inlined_call_operand.vmem [shape: bf16[32,32], index: 2, kind: input, shape index: {}]   ;;  %s8313_s3 = inlined_call_operand.vmem [shape: bf16[32,160], index: 3, kind: input, shape index: {}]   ;;  %s8314_s4 = inlined_call_operand.vmem [shape: f32[4,32,4], index: 4, kind: input, shape index: {}]   ;;  %s8315_s5 = inlined_call_operand.vmem [shape: f32[1,32], index: 5, kind: input, shape index: {}]   ;;  %s8316_s6 = inlined_call_operand.vmem [shape: f32[1,160], index: 6, kind: input, shape index: {}]   ;;  %s8317_s7 = inlined_call_operand.vmem [shape: f32[1,4], index: 7, kind: input, shape index: {}]   ;;  %s8318_s8 = inlined_call_operand.vmem [shape: f32[32,8,384], index: 8, kind: output, shape index: {}]  }
   0x1 LB: > { %s5796_s28 = sadd.s32 4294967295, %s6897_s27   ;;  %p5800_p0 = scmp.ge.s32.totalorder %s6897_s27, 1  ;;  %s6897_s27 = sphi %s6949_s27, %s18_s27  }
   0x2   : > { %p275_p1 = scmp.lt.s32.totalorder %s6897_s27, 3 }
   0x4   : > { %p276_p2 = pnand %p5800_p0, %p275_p1 }
   0x5   : > { %v6739_v0 = vld [vmem:[%s8312_s2] sm:$0xff] (!%p276_p2)   ;;  %s5801_s9 = sshll.u32 (!%p276_p2), %s5796_s28, 4  ;;  %v6740_v1 = vld [vmem:[%s8312_s2 + $0x8] sm:$0xff] (!%p276_p2)   ;;  %vm1057_vm0 = vcmask (!%p276_p2), 125952   ;;  %vm472_vm1 = vcmask (!%p276_p2), 261120   ;;  %v6899_v54 = vmov (!%p276_p2), 0   ;;  %v736_v55 = vlaneseq (!%p276_p2) }
   0x6   : > { %279 = sbr.rel (%p276_p2) target bundleno = 1790 (0x6fe), region = 52  ;;  %p317_p3 = scmp.lt.s32.totalorder (!%p276_p2), %s5801_s9, 31  ;;  %6121 = vmatprep.subr.bf16.mxu0 (!%p276_p2), %v6739_v0  ;;  %v6757_v49 = vld [vmem:[%s8313_s3] ss:$8 sps:$4 sm:$0xff] (!%p276_p2)   ;;  %v6759_v50 = vld [vmem:[%s8313_s3 + $0x4] ss:$8 sps:$4 sm:$0xff] (!%p276_p2)   ;;  %856 = vmatprep.mubr.bf16.mxu1 (!%p276_p2), %v6899_v54 }
   0x7   : > { %6122 = vmatpush3.bf16.msra.mxu0 (!%p276_p2), %v6739_v0  ;;  %6713 = vmatprep.subr.bf16.mxu1 (!%p276_p2), %v6759_v50  ;;  %v6760_v52 = vld [vmem:[%s8313_s3 + $0x14] ss:$8 sps:$4 sm:$0xff] (!%p276_p2)   ;;  %v6762_v53 = vld [vmem:[%s8313_s3 + $0x10] ss:$8 sps:$4 sm:$0xff] (!%p276_p2)   ;;  %v7104_v56 = vand.u32 (!%p276_p2), 127, %v736_v55 }
   0x8   : > { %6123 = vmatprep.subr.bf16.mxu0 (!%p276_p2), %v6740_v1  ;;  %6715 = vmatpush1.bf16.msra.mxu1 (!%p276_p2), %v6757_v49 }
   0x9   : > { %6714 = vmatprep.subr.bf16.mxu1 (!%p276_p2), %v6760_v52 }
   0xb   : > { %6124 = vmatpush3.bf16.msra.mxu0 (!%p276_p2), %v6740_v1 }
   0xc   : > { %814 = vmatprep.subr.bf16.mxu0 (!%p276_p2), %v6759_v50  ;;  %6716 = vmatpush1.bf16.msra.mxu1 (!%p276_p2), %v6762_v53 }
   0xd   : > { %s8335_s9 = smov (!%p317_p3, %s5801_s9), 31 }
   0xe   : > { %s5805_s12 = sshll.u32 %s8335_s9, 2  ;;  %s5934_s16 = sshll.u32 %s8335_s9, 3 }
   0xf   : > { %s6969_s15 = scalar_lea.vmem %s8311_s1, %s5805_s12  ;;  %s6978_s19 = scalar_lea.vmem %s8310_s0, %s5934_s16 }
  0x10   : > { %v6973_v2 = vld [vmem:[%s6969_s15] sm:$0xf]  ;;  %v6981_v3 = vld [vmem:[%s6969_s15 + $0x8] sm:$0xf]  ;;  %v6984_v4 = vld [vmem:[%s6969_s15 + $0x4] sm:$0xf] }
  0x11   : > { %v1058_v5 = vsel %vm1057_vm0, %v6973_v2, -inf  ;;  %v6741_v6 = vld [vmem:[%s6978_s19] sm:$0xff]   ;;  %v6742_v7 = vld [vmem:[%s6978_s19 + $0x8] sm:$0xff]   ;;  %v1064_v8 = vsel %vm1057_vm0, %v6981_v3, -inf  ;;  %v1061_v9 = vsel %vm1057_vm0, %v6984_v4, -inf  ;;  %v6743_v12 = vld [vmem:[%s6978_s19 + $0x10] sm:$0xff]  }
  0x12   : > { %1059 = vmax.xlane.f32.xlu0 %v1058_v5  ;;  %6125 = vmatprep.mubr.msk.bf16.mxu0 %vm472_vm1, %v6741_v6  ;;  %v6996_v10 = vld [vmem:[%s6969_s15 + $0xc] sm:$0xf]  ;;  %v6999_v11 = vld [vmem:[%s6969_s15 + $0x10] sm:$0xf]  ;;  %v7007_v14 = vld [vmem:[%s6969_s15 + $0x14] sm:$0xf] }
  0x13   : > { %1065 = vmax.xlane.f32.xlu1 %v1064_v8  ;;  %6126 = vmatmul.mubr.msk.bf16.vlgmr.msra.gmra.mrb[0].mxu0 %vm472_vm1, %v6742_v7  ;;  %v1067_v13 = vsel %vm1057_vm0, %v6996_v10, -inf  ;;  %v1070_v15 = vsel %vm1057_vm0, %v6999_v11, -inf  ;;  %v6744_v16 = vld [vmem:[%s6978_s19 + $0x18] sm:$0xff]   ;;  %v1073_v17 = vsel %vm1057_vm0, %v7007_v14, -inf  ;;  %v6745_v20 = vld [vmem:[%s6978_s19 + $0x20] sm:$0xff]   ;;  %v6746_v28 = vld [vmem:[%s6978_s19 + $0x28] sm:$0xff]  }
  0x14   : > { %6129 = vmatprep.mubr.msk.bf16.mxu0 %vm472_vm1, %v6743_v12  ;;  %v7015_v18 = vld [vmem:[%s6969_s15 + $0x18] sm:$0xf]  ;;  %v7018_v19 = vld [vmem:[%s6969_s15 + $0x1c] sm:$0xf]  ;;  %v7022_v21 = vld [vmem:[%s6969_s15 + $0x20] sm:$0xf]  ;;  %815 = vmatpush1.bf16.msra.mxu0 %v6757_v49 }
  0x15   : > { %v1076_v22 = vsel %vm1057_vm0, %v7015_v18, -inf  ;;  %v1079_v23 = vsel %vm1057_vm0, %v7018_v19, -inf  ;;  %v7030_v24 = vld [vmem:[%s6969_s15 + $0x24] sm:$0xf]  ;;  %v1082_v25 = vsel %vm1057_vm0, %v7022_v21, -inf  ;;  %v6747_v30 = vld [vmem:[%s6978_s19 + $0x30] sm:$0xff]   ;;  %816 = vmatprep.subr.bf16.mxu0 %v6760_v52 }
  0x16   : > { %1062 = vmax.xlane.f32.xlu0 %v1061_v9  ;;  %v7036_v26 = vld [vmem:[%s6969_s15 + $0x28] sm:$0xf]  ;;  %v1085_v27 = vsel %vm1057_vm0, %v7030_v24, -inf  ;;  %v7042_v29 = vld [vmem:[%s6969_s15 + $0x2c] sm:$0xf]  ;;  %v6748_v38 = vld [vmem:[%s6978_s19 + $0x38] sm:$0xff]  }
  0x17   : > { %1068 = vmax.xlane.f32.xlu1 %v1067_v13  ;;  %v1088_v31 = vsel %vm1057_vm0, %v7036_v26, -inf  ;;  %v1091_v32 = vsel %vm1057_vm0, %v7042_v29, -inf  ;;  %v7051_v33 = vld [vmem:[%s6969_s15 + $0x30] sm:$0xf]  ;;  %v7054_v34 = vld [vmem:[%s6969_s15 + $0x34] sm:$0xf] }
  0x18   : > { %v1094_v35 = vsel %vm1057_vm0, %v7051_v33, -inf  ;;  %v1097_v36 = vsel %vm1057_vm0, %v7054_v34, -inf  ;;  %v7062_v37 = vld [vmem:[%s6969_s15 + $0x38] sm:$0xf]  ;;  %v7066_v39 = vld [vmem:[%s6969_s15 + $0x3c] sm:$0xf]  ;;  %817 = vmatpush1.bf16.msra.mxu0 %v6762_v53 }
  0x19   : > { %v6749_v40 = vld [vmem:[%s6978_s19 + $0x40] sm:$0xff]   ;;  %v1100_v41 = vsel %vm1057_vm0, %v7062_v37, -inf  ;;  %v1103_v42 = vsel %vm1057_vm0, %v7066_v39, -inf  ;;  %v6750_v43 = vld [vmem:[%s6978_s19 + $0x48] sm:$0xff]   ;;  %v6751_v44 = vld [vmem:[%s6978_s19 + $0x50] sm:$0xff]   ;;  %s6725_s12 = smul.u32 24, %s8335_s9 }
  0x1a   : > { %1071 = vmax.xlane.f32.xlu0 %v1070_v15  ;;  %v6752_v45 = vld [vmem:[%s6978_s19 + $0x58] sm:$0xff]   ;;  %v6753_v46 = vld [vmem:[%s6978_s19 + $0x60] sm:$0xff]   ;;  %v6754_v47 = vld [vmem:[%s6978_s19 + $0x68] sm:$0xff]  }
  0x1b   : > { %1074 = vmax.xlane.f32.xlu1 %v1073_v17  ;;  %6130 = vmatmul.mubr.msk.bf16.gmra.mrb[4].mxu0 %vm472_vm1, %v6744_v16  ;;  %v6755_v48 = vld [vmem:[%s6978_s19 + $0x70] sm:$0xff]   ;;  %v6756_v51 = vld [vmem:[%s6978_s19 + $0x78] sm:$0xff]   ;;  %s7966_s15 = scalar_lea.vmem %s8318_s8, %s6725_s12 }
  0x1c   : > { %6133 = vmatprep.mubr.msk.bf16.mxu0 %vm472_vm1, %v6745_v20 }
  0x1e   : > { %1077 = vmax.xlane.f32.xlu0 %v1076_v22 }
  0x1f   : > { %1080 = vmax.xlane.f32.xlu1 %v1079_v23 }
  0x22   : > { %1083 = vmax.xlane.f32.xlu0 %v1082_v25 }
  0x23   : > { %1086 = vmax.xlane.f32.xlu1 %v1085_v27  ;;  %6134 = vmatmul.mubr.msk.bf16.gmra.mrb[8].mxu0 %vm472_vm1, %v6746_v28 }
  0x24   : > { %6137 = vmatprep.mubr.msk.bf16.mxu0 %vm472_vm1, %v6747_v30 }
  0x26   : > { %1089 = vmax.xlane.f32.xlu0 %v1088_v31 }
  0x27   : > { %1092 = vmax.xlane.f32.xlu1 %v1091_v32 }
  0x2a   : > { %1095 = vmax.xlane.f32.xlu0 %v1094_v35 }
  0x2b   : > { %1098 = vmax.xlane.f32.xlu1 %v1097_v36  ;;  %6138 = vmatmul.mubr.msk.bf16.gmra.mrb[12].mxu0 %vm472_vm1, %v6748_v38 }
  0x2c   : > { %6141 = vmatprep.mubr.msk.bf16.mxu0 %vm472_vm1, %v6749_v40 }
  0x2e   : > { %1101 = vmax.xlane.f32.xlu0 %v1100_v41 }
  0x2f   : > { %1104 = vmax.xlane.f32.xlu1 %v1103_v42 }
  0x33   : > { %6142 = vmatmul.mubr.msk.bf16.gmra.mrb[16].mxu0 %vm472_vm1, %v6750_v43 }
  0x34   : > { %6145 = vmatprep.mubr.msk.bf16.mxu0 %vm472_vm1, %v6751_v44 }
  0x3b   : > { %6146 = vmatmul.mubr.msk.bf16.gmra.mrb[20].mxu0 %vm472_vm1, %v6752_v45 }
  0x3c   : > { %6149 = vmatprep.mubr.msk.bf16.mxu0 %vm472_vm1, %v6753_v46 }
  0x43   : > { %6150 = vmatmul.mubr.msk.bf16.gmra.mrb[24].mxu0 %vm472_vm1, %v6754_v47 }
  0x44   : > { %6153 = vmatprep.mubr.msk.bf16.mxu0 %vm472_vm1, %v6755_v48 }
  0x4b   : > { %6154 = vmatmul.mubr.msk.bf16.gmra.mrb[28].mxu0 %vm472_vm1, %v6756_v51 }
  0x4c   : > { %846 = vmatprep.mubr.bf16.mxu0 %v6899_v54 }
  0x9f   : > { %v1060_v57 = vpop.xlane.xlu0 %1059 }
  0xa0   : > { %vm1106_vm2 = vcmp.eq.f32.partialorder %v6973_v2, %v1060_v57  ;;  %v1066_v58 = vpop.xlane.xlu1 %1065 }
  0xa1   : > { %v1122_v59 = vsel %vm1106_vm2, %v7104_v56, 16  ;;  %vm1108_vm3 = vcmp.eq.f32.partialorder %v6981_v3, %v1066_v58 }
  0xa2   : > { %v7110_v60 = vsel %vm1057_vm0, %v1122_v59, 2147483647  ;;  %v1124_v61 = vsel %vm1108_vm3, %v7104_v56, 16 }
  0xa3   : > { %v7114_v62 = vsel %vm1057_vm0, %v1124_v61, 2147483647  ;;  %v1063_v63 = vpop.xlane.xlu0 %1062  ;;  %v1140_v0 = vshra.s32 %v7110_v60, 16 }
  0xa4   : > { %vm1107_vm4 = vcmp.eq.f32.partialorder %v6984_v4, %v1063_v63  ;;  %v1069_v1 = vpop.xlane.xlu1 %1068  ;;  %v1170_v2 = vshra.s32 %v7114_v62, 16 }
  0xa5   : > { %v1123_v5 = vsel %vm1107_vm4, %v7104_v56, 16  ;;  %vm1109_vm5 = vcmp.eq.f32.partialorder %v6996_v10, %v1069_v1  ;;  %v7121_v3 = vcvt.s32.f32 %v1140_v0 }
  0xa6   : > { %v7124_v6 = vsel %vm1057_vm0, %v1123_v5, 2147483647  ;;  %v1125_v7 = vsel %vm1109_vm5, %v7104_v56, 16  ;;  %v7131_v9 = vcvt.s32.f32 %v1170_v2 }
  0xa7   : > { %v7128_v8 = vsel %vm1057_vm0, %v1125_v7, 2147483647  ;;  %1143 = vmin.xlane.f32.xlu0 %v7121_v3  ;;  %v1072_v4 = vpop.xlane.xlu0 %1071  ;;  %v1155_v12 = vshra.s32 %v7124_v6, 16 }
  0xa8   : > { %vm1110_vm6 = vcmp.eq.f32.partialorder %v6999_v11, %v1072_v4  ;;  %v1075_v10 = vpop.xlane.xlu1 %1074  ;;  %v1185_v13 = vshra.s32 %v7128_v8, 16 }
  0xa9   : > { %v1126_v15 = vsel %vm1110_vm6, %v7104_v56, 16  ;;  %vm1111_vm7 = vcmp.eq.f32.partialorder %v7007_v14, %v1075_v10  ;;  %v7138_v16 = vcvt.s32.f32 %v1155_v12 }
  0xaa   : > { %v7141_v17 = vsel %vm1057_vm0, %v1126_v15, 2147483647  ;;  %v1127_v20 = vsel %vm1111_vm7, %v7104_v56, 16  ;;  %v7149_v23 = vcvt.s32.f32 %v1185_v13 }
  0xab   : > { %v7145_v22 = vsel %vm1057_vm0, %v1127_v20, 2147483647  ;;  %1173 = vmin.xlane.f32.xlu0 %v7131_v9  ;;  %1158 = vmin.xlane.f32.xlu1 %v7138_v16  ;;  %v1078_v11 = vpop.xlane.xlu0 %1077  ;;  %v1200_v25 = vshra.s32 %v7141_v17, 16 }
  0xac   : > { %vm1112_vm8 = vcmp.eq.f32.partialorder %v7015_v18, %v1078_v11  ;;  %v1081_v14 = vpop.xlane.xlu1 %1080  ;;  %v1215_v27 = vshra.s32 %v7145_v22, 16 }
  0xad   : > { %v1128_v28 = vsel %vm1112_vm8, %v7104_v56, 16  ;;  %vm1113_vm9 = vcmp.eq.f32.partialorder %v7018_v19, %v1081_v14  ;;  %v7156_v30 = vcvt.s32.f32 %v1200_v25 }
  0xae   : > { %v7159_v31 = vsel %vm1057_vm0, %v1128_v28, 2147483647  ;;  %v1129_v32 = vsel %vm1113_vm9, %v7104_v56, 16  ;;  %v7167_v36 = vcvt.s32.f32 %v1215_v27  ;;  %v7253_v27 = vld [vmem:[%s8315_s5] ss:$0 sm:$0xff] }
  0xaf   : > { %v7163_v35 = vsel %vm1057_vm0, %v1129_v32, 2147483647  ;;  %1188 = vmin.xlane.f32.xlu1 %v7149_v23  ;;  %1203 = vmin.xlane.f32.xlu0 %v7156_v30  ;;  %v1084_v18 = vpop.xlane.xlu0 %1083  ;;  %v1230_v38 = vshra.s32 %v7159_v31, 16 }
  0xb0   : > { %vm1114_vm10 = vcmp.eq.f32.partialorder %v7022_v21, %v1084_v18  ;;  %v1087_v19 = vpop.xlane.xlu1 %1086  ;;  %v1245_v40 = vshra.s32 %v7163_v35, 16 }
  0xb1   : > { %v1130_v41 = vsel %vm1114_vm10, %v7104_v56, 16  ;;  %vm1115_vm11 = vcmp.eq.f32.partialorder %v7030_v24, %v1087_v19  ;;  %v7174_v42 = vcvt.s32.f32 %v1230_v38 }
  0xb2   : > { %v7177_v43 = vsel %vm1057_vm0, %v1130_v41, 2147483647  ;;  %v1131_v44 = vsel %vm1115_vm11, %v7104_v56, 16  ;;  %v7185_v46 = vcvt.s32.f32 %v1245_v40 }
  0xb3   : > { %v7181_v45 = vsel %vm1057_vm0, %v1131_v44, 2147483647  ;;  %1218 = vmin.xlane.f32.xlu1 %v7167_v36  ;;  %1233 = vmin.xlane.f32.xlu0 %v7174_v42  ;;  %v1090_v21 = vpop.xlane.xlu0 %1089  ;;  %v1260_v47 = vshra.s32 %v7177_v43, 16 }
  0xb4   : > { %vm1116_vm12 = vcmp.eq.f32.partialorder %v7036_v26, %v1090_v21  ;;  %v1093_v24 = vpop.xlane.xlu1 %1092  ;;  %v1275_v48 = vshra.s32 %v7181_v45, 16 }
  0xb5   : > { %v1132_v49 = vsel %vm1116_vm12, %v7104_v56, 16  ;;  %vm1117_vm13 = vcmp.eq.f32.partialorder %v7042_v29, %v1093_v24  ;;  %v7192_v50 = vcvt.s32.f32 %v1260_v47 }
  0xb6   : > { %v7195_v51 = vsel %vm1057_vm0, %v1132_v49, 2147483647  ;;  %v1133_v52 = vsel %vm1117_vm13, %v7104_v56, 16  ;;  %v7203_v57 = vcvt.s32.f32 %v1275_v48 }
  0xb7   : > { %v7199_v53 = vsel %vm1057_vm0, %v1133_v52, 2147483647  ;;  %1248 = vmin.xlane.f32.xlu1 %v7185_v46  ;;  %1263 = vmin.xlane.f32.xlu0 %v7192_v50  ;;  %v1096_v26 = vpop.xlane.xlu0 %1095  ;;  %v1290_v58 = vshra.s32 %v7195_v51, 16 }
  0xb8   : > { %vm1118_vm14 = vcmp.eq.f32.partialorder %v7051_v33, %v1096_v26  ;;  %v1099_v29 = vpop.xlane.xlu1 %1098  ;;  %v1305_v59 = vshra.s32 %v7199_v53, 16 }
  0xb9   : > { %v1134_v61 = vsel %vm1118_vm14, %v7104_v56, 16  ;;  %vm1119_vm15 = vcmp.eq.f32.partialorder %v7054_v34, %v1099_v29  ;;  %v7210_v63 = vcvt.s32.f32 %v1290_v58 }
  0xba   : > { %v7213_v0 = vsel %vm1057_vm0, %v1134_v61, 2147483647  ;;  %v1135_v1 = vsel %vm1119_vm15, %v7104_v56, 16  ;;  %v7221_v5 = vcvt.s32.f32 %v1305_v59 }
  0xbb   : > { %v7217_v2 = vsel %vm1057_vm0, %v1135_v1, 2147483647  ;;  %1278 = vmin.xlane.f32.xlu1 %v7203_v57  ;;  %1293 = vmin.xlane.f32.xlu0 %v7210_v63  ;;  %v1102_v33 = vpop.xlane.xlu0 %1101  ;;  %v1320_v7 = vshra.s32 %v7213_v0, 16 }
  0xbc   : > { %vm1120_vm2 = vcmp.eq.f32.partialorder %v7062_v37, %v1102_v33  ;;  %v1105_v34 = vpop.xlane.xlu1 %1104  ;;  %v1335_v4 = vshra.s32 %v7217_v2, 16 }
  0xbd   : > { %v1136_v12 = vsel %vm1120_vm2, %v7104_v56, 16  ;;  %vm1121_vm3 = vcmp.eq.f32.partialorder %v7066_v39, %v1105_v34  ;;  %v7228_v10 = vcvt.s32.f32 %v1320_v7 }
  0xbe   : > { %v7231_v13 = vsel %vm1057_vm0, %v1136_v12, 2147483647  ;;  %v1137_v15 = vsel %vm1121_vm3, %v7104_v56, 16  ;;  %v7239_v37 = vcvt.s32.f32 %v1335_v4 }
  0xbf   : > { %v7235_v20 = vsel %vm1057_vm0, %v1137_v15, 2147483647  ;;  %1308 = vmin.xlane.f32.xlu1 %v7221_v5  ;;  %1323 = vmin.xlane.f32.xlu0 %v7228_v10  ;;  %v1350_v11 = vshra.s32 %v7231_v13, 16 }
  0xc0   : > { %v1365_v39 = vshra.s32 %v7235_v20, 16 }
  0xc1   : > { %v7243_v25 = vcvt.s32.f32 %v1350_v11 }
  0xc2   : > { %v7247_v14 = vcvt.s32.f32 %v1365_v39 }
  0xc3   : > { %1338 = vmin.xlane.f32.xlu1 %v7239_v37  ;;  %1353 = vmin.xlane.f32.xlu0 %v7243_v25 }
  0xc7   : > { %1368 = vmin.xlane.f32.xlu1 %v7247_v14 }
  0xe6   : > { %v6127_v28 = vpop.f32.mrb[0].mxu0 }
  0xe7   : > { %v564_v32 = vadd.f32 %v6127_v28, %v7253_v27  ;;  %v555_v18 = vpop.f32.mrb[1].mxu0 }
  0xe8   : > { %v556_v38 = vadd.f32 %v7253_v27, %v555_v18  ;;  %v6128_v19 = vpop.f32.mrb[2].mxu0 }
  0xe9   : > { %v567_v40 = vadd.f32 %v6128_v19, %v7253_v27  ;;  %v558_v41 = vpop.f32.mrb[3].mxu0  ;;  %v684_v21 = vmax.f32 %v564_v32, 0.0 }
  0xea   : > { %v559_v44 = vadd.f32 %v7253_v27, %v558_v41  ;;  %v682_v24 = vmax.f32 %v556_v38, 0.0 }
  0xeb   : > { %v685_v47 = vmax.f32 %v567_v40, 0.0 }
  0xec   : > { %v683_v48 = vmax.f32 %v559_v44, 0.0 }
  0xed   : > { %v715_v49 = vpack.c.bf16 %v685_v47, %v684_v21 }
  0xee   : > { %v714_v52 = vpack.c.bf16 %v683_v48, %v682_v24  ;;  %v6131_v26 = vpop.f32.mrb[4].mxu0 }
  0xef   : > { %v580_v58 = vadd.f32 %v6131_v26, %v7253_v27  ;;  %v571_v29 = vpop.f32.mrb[5].mxu0  ;;  %5848 = vmatmul.mubr.msk.bf16.vlgmr.msra.gmra.mrb[0].mxu1 %vm472_vm1, %v715_v49 }
  0xf0   : > { %v572_v59 = vadd.f32 %v7253_v27, %v571_v29  ;;  %v6132_v61 = vpop.f32.mrb[6].mxu0  ;;  %5847 = vmatmul.mubr.msk.bf16.vlgmr.msra.gmra.mrb[32].mxu0 %vm472_vm1, %v714_v52  ;;  %866 = vmatprep.mubr.bf16.mxu1 %v6899_v54 }
  0xf1   : > { %v583_v1 = vadd.f32 %v6132_v61, %v7253_v27  ;;  %v574_v33 = vpop.f32.mrb[7].mxu0  ;;  %v688_v34 = vmax.f32 %v580_v58, 0.0 }
  0xf2   : > { %v575_v7 = vadd.f32 %v7253_v27, %v574_v33  ;;  %v686_v12 = vmax.f32 %v572_v59, 0.0 }
  0xf3   : > { %v689_v4 = vmax.f32 %v583_v1, 0.0 }
  0xf4   : > { %v687_v15 = vmax.f32 %v575_v7, 0.0 }
  0xf5   : > { %v717_v11 = vpack.c.bf16 %v689_v4, %v688_v34 }
  0xf6   : > { %v716_v39 = vpack.c.bf16 %v687_v15, %v686_v12  ;;  %v6135_v28 = vpop.f32.mrb[8].mxu0 }
  0xf7   : > { %v596_v32 = vadd.f32 %v6135_v28, %v7253_v27  ;;  %v587_v18 = vpop.f32.mrb[9].mxu0 }
  0xf8   : > { %5849 = vmatmul.mubr.msk.bf16.gmra.mrb[4].mxu1 %vm472_vm1, %v716_v39  ;;  %v588_v38 = vadd.f32 %v7253_v27, %v587_v18  ;;  %v6136_v19 = vpop.f32.mrb[10].mxu0 }
  0xf9   : > { %v692_v40 = vmax.f32 %v596_v32, 0.0  ;;  %v599_v41 = vadd.f32 %v6136_v19, %v7253_v27  ;;  %v590_v44 = vpop.f32.mrb[11].mxu0  ;;  %876 = vmatprep.mubr.bf16.mxu1 %v6899_v54 }
  0xfa   : > { %v690_v21 = vmax.f32 %v588_v38, 0.0  ;;  %v591_v47 = vadd.f32 %v7253_v27, %v590_v44 }
  0xfb   : > { %v693_v24 = vmax.f32 %v599_v41, 0.0 }
  0xfc   : > { %v691_v48 = vmax.f32 %v591_v47, 0.0 }
  0xfd   : > { %v719_v49 = vpack.c.bf16 %v693_v24, %v692_v40 }
  0xfe   : > { %v718_v52 = vpack.c.bf16 %v691_v48, %v690_v21  ;;  %v6139_v26 = vpop.f32.mrb[12].mxu0 }
  0xff   : > { %v612_v58 = vadd.f32 %v6139_v26, %v7253_v27  ;;  %v603_v29 = vpop.f32.mrb[13].mxu0 }
 0x100   : > { %5850 = vmatmul.mubr.msk.bf16.gmra.mrb[8].mxu1 %vm472_vm1, %v717_v11  ;;  %v604_v59 = vadd.f32 %v7253_v27, %v603_v29  ;;  %v6140_v61 = vpop.f32.mrb[14].mxu0 }
 0x101   : > { %886 = vmatprep.mubr.bf16.mxu1 %v6899_v54  ;;  %v696_v1 = vmax.f32 %v612_v58, 0.0  ;;  %v615_v33 = vadd.f32 %v6140_v61, %v7253_v27  ;;  %v606_v7 = vpop.f32.mrb[15].mxu0 }
 0x102   : > { %v694_v34 = vmax.f32 %v604_v59, 0.0  ;;  %v607_v4 = vadd.f32 %v7253_v27, %v606_v7 }
 0x103   : > { %v697_v12 = vmax.f32 %v615_v33, 0.0 }
 0x104   : > { %v695_v15 = vmax.f32 %v607_v4, 0.0 }
 0x105   : > { %v721_v39 = vpack.c.bf16 %v697_v12, %v696_v1 }
 0x106   : > { %v720_v28 = vpack.c.bf16 %v695_v15, %v694_v34  ;;  %v6143_v32 = vpop.f32.mrb[16].mxu0 }
 0x107   : > { %v628_v18 = vadd.f32 %v6143_v32, %v7253_v27  ;;  %v619_v11 = vpop.f32.mrb[17].mxu0 }
 0x108   : > { %5851 = vmatmul.mubr.msk.bf16.gmra.mrb[12].mxu1 %vm472_vm1, %v718_v52  ;;  %v620_v38 = vadd.f32 %v7253_v27, %v619_v11  ;;  %v6144_v19 = vpop.f32.mrb[18].mxu0 }
 0x109   : > { %896 = vmatprep.mubr.bf16.mxu1 %v6899_v54  ;;  %v700_v40 = vmax.f32 %v628_v18, 0.0  ;;  %v631_v41 = vadd.f32 %v6144_v19, %v7253_v27  ;;  %v622_v44 = vpop.f32.mrb[19].mxu0 }
 0x10a   : > { %v698_v21 = vmax.f32 %v620_v38, 0.0  ;;  %v623_v47 = vadd.f32 %v7253_v27, %v622_v44 }
 0x10b   : > { %v701_v24 = vmax.f32 %v631_v41, 0.0 }
 0x10c   : > { %v699_v48 = vmax.f32 %v623_v47, 0.0 }
 0x10d   : > { %v723_v26 = vpack.c.bf16 %v701_v24, %v700_v40 }
 0x10e   : > { %v722_v58 = vpack.c.bf16 %v699_v48, %v698_v21  ;;  %v6147_v29 = vpop.f32.mrb[20].mxu0 }
 0x10f   : > { %v644_v59 = vadd.f32 %v6147_v29, %v7253_v27  ;;  %v635_v52 = vpop.f32.mrb[21].mxu0 }
 0x110   : > { %5852 = vmatmul.mubr.msk.bf16.gmra.mrb[16].mxu1 %vm472_vm1, %v719_v49  ;;  %v636_v61 = vadd.f32 %v7253_v27, %v635_v52  ;;  %v6148_v1 = vpop.f32.mrb[22].mxu0 }
 0x111   : > { %906 = vmatprep.mubr.bf16.mxu1 %v6899_v54  ;;  %v704_v33 = vmax.f32 %v644_v59, 0.0  ;;  %v647_v7 = vadd.f32 %v6148_v1, %v7253_v27  ;;  %v638_v34 = vpop.f32.mrb[23].mxu0 }
 0x112   : > { %v702_v4 = vmax.f32 %v636_v61, 0.0  ;;  %v639_v12 = vadd.f32 %v7253_v27, %v638_v34 }
 0x113   : > { %v705_v15 = vmax.f32 %v647_v7, 0.0 }
 0x114   : > { %v703_v32 = vmax.f32 %v639_v12, 0.0 }
 0x115   : > { %v7290_v18 = vpack.c.bf16 %v705_v15, %v704_v33 }
 0x116   : > { %v724_v11 = vpack.c.bf16 %v703_v32, %v702_v4  ;;  %v6151_v38 = vpop.f32.mrb[24].mxu0 }
 0x117   : > { %v660_v49 = vadd.f32 %v6151_v38, %v7253_v27  ;;  %v651_v19 = vpop.f32.mrb[25].mxu0 }
 0x118   : > { %5853 = vmatmul.mubr.msk.bf16.gmra.mrb[20].mxu1 %vm472_vm1, %v720_v28  ;;  %v652_v40 = vadd.f32 %v7253_v27, %v651_v19  ;;  %v6152_v41 = vpop.f32.mrb[26].mxu0 }
 0x119   : > { %916 = vmatprep.mubr.bf16.mxu1 %v6899_v54  ;;  %v708_v44 = vmax.f32 %v660_v49, 0.0  ;;  %v663_v21 = vadd.f32 %v6152_v41, %v7253_v27  ;;  %v654_v47 = vpop.f32.mrb[27].mxu0 }
 0x11a   : > { %v706_v24 = vmax.f32 %v652_v40, 0.0  ;;  %v655_v48 = vadd.f32 %v7253_v27, %v654_v47  ;;  %v1169_v47 = vand.u32 65535, %v7114_v62 }
 0x11b   : > { %v709_v29 = vmax.f32 %v663_v21, 0.0 }
 0x11c   : > { %v707_v59 = vmax.f32 %v655_v48, 0.0 }
 0x11d   : > { %v7298_v52 = vpack.c.bf16 %v709_v29, %v708_v44  ;;  %v1184_v29 = vand.u32 65535, %v7128_v8 }
 0x11e   : > { %v7300_v61 = vpack.c.bf16 %v707_v59, %v706_v24  ;;  %v6155_v1 = vpop.f32.mrb[28].mxu0  ;;  %v1199_v59 = vand.u32 65535, %v7141_v17 }
 0x11f   : > { %v676_v28 = vadd.f32 %v6155_v1, %v7253_v27  ;;  %v667_v33 = vpop.f32.mrb[29].mxu0  ;;  %v1186_v8 = vcvt.s32.f32 %v1184_v29 }
 0x120   : > { %5854 = vmatmul.mubr.msk.bf16.gmra.mrb[24].mxu1 %vm472_vm1, %v721_v39  ;;  %v668_v7 = vadd.f32 %v7253_v27, %v667_v33  ;;  %v6156_v34 = vpop.f32.mrb[30].mxu0  ;;  %v1139_v39 = vand.u32 65535, %v7110_v60  ;;  %v1201_v17 = vcvt.s32.f32 %v1199_v59 }
 0x121   : > { %926 = vmatprep.mubr.bf16.mxu1 %v6899_v54  ;;  %v712_v4 = vmax.f32 %v676_v28, 0.0  ;;  %v679_v12 = vadd.f32 %v6156_v34, %v7253_v27  ;;  %v670_v15 = vpop.f32.mrb[31].mxu0  ;;  %v1229_v28 = vand.u32 65535, %v7159_v31  ;;  %v1259_v31 = vand.u32 65535, %v7177_v43 }
 0x122   : > { %v710_v32 = vmax.f32 %v668_v7, 0.0  ;;  %v671_v38 = vadd.f32 %v7253_v27, %v670_v15  ;;  %v1141_v21 = vcvt.s32.f32 %v1139_v39  ;;  %v1154_v27 = vand.u32 65535, %v7124_v6 }
 0x123   : > { %v713_v49 = vmax.f32 %v679_v12, 0.0  ;;  %v1261_v15 = vcvt.s32.f32 %v1259_v31 }
 0x124   : > { %v711_v19 = vmax.f32 %v671_v38, 0.0  ;;  %v1156_v60 = vcvt.s32.f32 %v1154_v27 }
 0x125   : > { %v7308_v40 = vpack.c.bf16 %v713_v49, %v712_v4  ;;  %v1231_v4 = vcvt.s32.f32 %v1229_v28 }
 0x126   : > { %v7310_v41 = vpack.c.bf16 %v711_v19, %v710_v32  ;;  %v1289_v32 = vand.u32 65535, %v7195_v51  ;;  %v1319_v51 = vand.u32 65535, %v7213_v0 }
 0x128   : > { %5855 = vmatmul.mubr.msk.bf16.gmra.mrb[28].mxu1 %vm472_vm1, %v722_v58  ;;  %v1291_v39 = vcvt.s32.f32 %v1289_v32  ;;  %v1321_v27 = vcvt.s32.f32 %v1319_v51 }
 0x129   : > { %936 = vmatprep.mubr.bf16.mxu1 %v6899_v54 }
 0x130   : > { %5856 = vmatmul.mubr.msk.bf16.gmra.mrb[32].mxu1 %vm472_vm1, %v723_v26  ;;  %v1171_v26 = vcvt.s32.f32 %v1169_v47  ;;  %v1349_v47 = vand.u32 65535, %v7231_v13 }
 0x131   : > { %946 = vmatprep.mubr.bf16.mxu1 %v6899_v54 }
 0x132   : > { %v1351_v29 = vcvt.s32.f32 %v1349_v47 }
 0x134   : > { %v7317_v44 = vpop.xlane.xlu0 %1143 }
 0x135   : > { %vm1145_vm4 = vcmp.eq.f32.partialorder %v7121_v3, %v7317_v44 }
 0x136   : > { %v1146_v24 = vsel %vm1145_vm4, %v1141_v21, inf }
 0x137   : > { %1147 = vmin.xlane.f32.xlu0 %v1146_v24 }
 0x138   : > { %v7323_v58 = vpop.xlane.xlu1 %1158  ;;  %v7325_v48 = vpop.xlane.xlu0 %1173  ;;  %5857 = vmatmul.mubr.msk.bf16.gmra.mrb[36].mxu1 %vm472_vm1, %v724_v11  ;;  %v1214_v11 = vand.u32 65535, %v7145_v22  ;;  %v1244_v22 = vand.u32 65535, %v7163_v35 }
 0x139   : > { %vm1160_vm5 = vcmp.eq.f32.partialorder %v7138_v16, %v7323_v58  ;;  %vm1175_vm6 = vcmp.eq.f32.partialorder %v7131_v9, %v7325_v48  ;;  %956 = vmatprep.mubr.bf16.mxu1 %v6899_v54 }
 0x13a   : > { %v1161_v62 = vsel %vm1160_vm5, %v1156_v60, inf  ;;  %v1176_v3 = vsel %vm1175_vm6, %v1171_v26, inf  ;;  %v1216_v34 = vcvt.s32.f32 %v1214_v11  ;;  %v1246_v43 = vcvt.s32.f32 %v1244_v22 }
 0x13b   : > { %1162 = vmin.xlane.f32.xlu1 %v1161_v62  ;;  %1177 = vmin.xlane.f32.xlu0 %v1176_v3  ;;  %vm6901_vm6 = vmmov 0  }
 0x13c   : > { %v7335_v6 = vpop.xlane.xlu1 %1188  ;;  %v7337_v1 = vpop.xlane.xlu0 %1203 }
 0x13d   : > { %vm1190_vm7 = vcmp.eq.f32.partialorder %v7149_v23, %v7335_v6  ;;  %vm1205_vm8 = vcmp.eq.f32.partialorder %v7156_v30, %v7337_v1 }
 0x13e   : > { %v1191_v9 = vsel %vm1190_vm7, %v1186_v8, inf  ;;  %v1206_v16 = vsel %vm1205_vm8, %v1201_v17, inf  ;;  %vm1426_vm8 = vcmask 130048  }
 0x13f   : > { %1192 = vmin.xlane.f32.xlu1 %v1191_v9  ;;  %1207 = vmin.xlane.f32.xlu0 %v1206_v16 }
 0x140   : > { %v7345_v33 = vpop.xlane.xlu1 %1218  ;;  %v7347_v7 = vpop.xlane.xlu0 %1233  ;;  %5858 = vmatmul.mubr.msk.bf16.gmra.mrb[40].mxu1 %vm472_vm1, %v7290_v18  ;;  %v1274_v18 = vand.u32 65535, %v7181_v45  ;;  %v1304_v45 = vand.u32 65535, %v7199_v53 }
 0x141   : > { %vm1220_vm9 = vcmp.eq.f32.partialorder %v7167_v36, %v7345_v33  ;;  %vm1235_vm10 = vcmp.eq.f32.partialorder %v7174_v42, %v7347_v7  ;;  %966 = vmatprep.mubr.bf16.mxu1 %v6899_v54 }
 0x142   : > { %v1221_v23 = vsel %vm1220_vm9, %v1216_v34, inf  ;;  %v1236_v30 = vsel %vm1235_vm10, %v1231_v4, inf  ;;  %v1276_v19 = vcvt.s32.f32 %v1274_v18  ;;  %v1306_v0 = vcvt.s32.f32 %v1304_v45 }
 0x143   : > { %1222 = vmin.xlane.f32.xlu1 %v1221_v23  ;;  %1237 = vmin.xlane.f32.xlu0 %v1236_v30 }
 0x144   : > { %v7358_v12 = vpop.xlane.xlu1 %1248  ;;  %v7360_v35 = vpop.xlane.xlu0 %1263 }
 0x145   : > { %vm1250_vm11 = vcmp.eq.f32.partialorder %v7185_v46, %v7358_v12  ;;  %vm1265_vm12 = vcmp.eq.f32.partialorder %v7192_v50, %v7360_v35 }
 0x146   : > { %v1251_v36 = vsel %vm1250_vm11, %v1246_v43, inf  ;;  %v1266_v42 = vsel %vm1265_vm12, %v1261_v15, inf }
 0x147   : > { %1252 = vmin.xlane.f32.xlu1 %v1251_v36  ;;  %1267 = vmin.xlane.f32.xlu0 %v1266_v42  ;;  %v1150_v42 = vcvt.f32.s32 %v7317_v44 }
 0x148   : > { %v7368_v38 = vpop.xlane.xlu1 %1278  ;;  %v7370_v49 = vpop.xlane.xlu0 %1293  ;;  %5859 = vmatmul.mubr.msk.bf16.gmra.mrb[44].mxu1 %vm472_vm1, %v7300_v61  ;;  %v1334_v61 = vand.u32 65535, %v7217_v2  ;;  %v1364_v2 = vand.u32 65535, %v7235_v20 }
 0x149   : > { %vm1280_vm13 = vcmp.eq.f32.partialorder %v7203_v57, %v7368_v38  ;;  %vm1295_vm14 = vcmp.eq.f32.partialorder %v7210_v63, %v7370_v49  ;;  %976 = vmatprep.mubr.bf16.mxu1 %v6899_v54 }
 0x14a   : > { %v1281_v46 = vsel %vm1280_vm13, %v1276_v19, inf  ;;  %v1296_v50 = vsel %vm1295_vm14, %v1291_v39, inf  ;;  %v1336_v26 = vcvt.s32.f32 %v1334_v61  ;;  %v1366_v59 = vcvt.s32.f32 %v1364_v2 }
 0x14b   : > { %1282 = vmin.xlane.f32.xlu1 %v1281_v46  ;;  %1297 = vmin.xlane.f32.xlu0 %v1296_v50 }
 0x14c   : > { %v7381_v21 = vpop.xlane.xlu1 %1308  ;;  %v7383_v53 = vpop.xlane.xlu0 %1323 }
 0x14d   : > { %vm1310_vm15 = vcmp.eq.f32.partialorder %v7221_v5, %v7381_v21  ;;  %vm1325_vm2 = vcmp.eq.f32.partialorder %v7228_v10, %v7383_v53 }
 0x14e   : > { %v1311_v57 = vsel %vm1310_vm15, %v1306_v0, inf  ;;  %v1326_v63 = vsel %vm1325_vm2, %v1321_v27, inf  ;;  %v1151_v0 = vshll.u32 %v1150_v42, 16  ;;  %v1165_v27 = vcvt.f32.s32 %v7323_v58 }
 0x14f   : > { %1312 = vmin.xlane.f32.xlu1 %v1311_v57  ;;  %1327 = vmin.xlane.f32.xlu0 %v1326_v63 }
 0x150   : > { %v7391_v24 = vpop.xlane.xlu1 %1338  ;;  %v7393_v60 = vpop.xlane.xlu0 %1353  ;;  %5860 = vmatmul.mubr.msk.bf16.gmra.mrb[48].mxu1 %vm472_vm1, %v7298_v52  ;;  %v6900_v52 = vmov 0.0|0.0  }
 0x151   : > { %vm1340_vm3 = vcmp.eq.f32.partialorder %v7239_v37, %v7391_v24  ;;  %vm1355_vm4 = vcmp.eq.f32.partialorder %v7243_v25, %v7393_v60  ;;  %986 = vmatprep.mubr.bf16.mxu1 %v6899_v54  ;;  %6537 = vmatprep.subr.bf16.mxu0 %v6900_v52  ;;  %v6902_v37 = vmov 0.0   ;;  %v7419_v25 = vshrl.u32 %v736_v55, 7 }
 0x152   : > { %v1341_v5 = vsel %vm1340_vm3, %v1336_v26, inf  ;;  %v1356_v10 = vsel %vm1355_vm4, %v1351_v29, inf  ;;  %6591 = vmatprep.subr.bf16.mxu1 %v6900_v52  ;;  %6161 = vmatprep.mubr.msk.f32.mxu0 %vm6901_vm6, %v6902_v37 }
 0x153   : > { %1342 = vmin.xlane.f32.xlu1 %v1341_v5  ;;  %1357 = vmin.xlane.f32.xlu0 %v1356_v10  ;;  %v742_v62 = vsub.s32 1, %v7419_v25 }
 0x154   : > { %v7403_v13 = vpop.xlane.xlu1 %1368 }
 0x155   : > { %vm1370_vm5 = vcmp.eq.f32.partialorder %v7247_v14, %v7403_v13  ;;  %v738_v14 = vsub.s32 0, %v7419_v25 }
 0x156   : > { %v1371_v20 = vsel %vm1370_vm5, %v1366_v59, inf }
 0x157   : > { %1372 = vmin.xlane.f32.xlu1 %v1371_v20  ;;  %v1166_v20 = vshll.u32 %v1165_v27, 16 }
 0x158   : > { %5861 = vmatmul.mubr.msk.bf16.gmra.mrb[52].mxu1 %vm472_vm1, %v7310_v41  ;;  %v734_v41 = vld [vmem:[%s8316_s6] sm:$0x3] }
 0x159   : > { %996 = vmatprep.mubr.bf16.mxu1 %v6899_v54  ;;  %v7426_v3 = vrot.slane %v734_v41, %v738_v14  ;;  %v7428_v8 = vrot.slane %v734_v41, %v742_v62  ;;  %v1180_v14 = vcvt.f32.s32 %v7325_v48 }
 0x15b   : > { %v1181_v48 = vshll.u32 %v1180_v14, 16 }
 0x160   : > { %5862 = vmatmul.mubr.msk.bf16.gmra.mrb[56].mxu1 %vm472_vm1, %v7308_v40 }
 0x161   : > { %6287 = vmatprep.mubr.msk.f32.mxu1 %vm6901_vm6, %v6902_v37 }
 0x1c2   : > { %v858_v54 = vpop.f32.mrb[0].mxu1 }
 0x1c3   : > { %v859_v40 = vadd.f32 %v858_v54, %v7426_v3  ;;  %v848_v17 = vpop.f32.mrb[32].mxu0  ;;  %v860_v55 = vpop.f32.mrb[1].mxu1 }
 0x1c4   : > { %v849_v11 = vadd.f32 %v848_v17, %v7426_v3  ;;  %v850_v28 = vpop.f32.mrb[33].mxu0  ;;  %v862_v9 = vpop.f32.mrb[2].mxu1  ;;  %v7433_v34 = vadd.f32 %v860_v55, %v7428_v8 }
 0x1c5   : > { %v852_v16 = vpop.f32.mrb[34].mxu0  ;;  %6763 = vtanh.f32 %v859_v40  ;;  %v863_v4 = vadd.f32 %v862_v9, %v7426_v3  ;;  %v864_v31 = vpop.f32.mrb[3].mxu1  ;;  %v7438_v30 = vadd.f32 %v850_v28, %v7428_v8 }
 0x1c6   : > { %v853_v22 = vadd.f32 %v852_v16, %v7426_v3  ;;  %v854_v23 = vpop.f32.mrb[35].mxu0  ;;  %6765 = vtanh.f32 %v849_v11  ;;  %v7441_v43 = vadd.f32 %v864_v31, %v7428_v8  ;;  %v1148_v36 = vpop.xlane.xlu0 %1147 }
 0x1c7   : > { %v7444_v15 = vadd.f32 %v854_v23, %v7428_v8  ;;  %6767 = vtanh.f32 %v863_v4  ;;  %v1149_v39 = vcvt.f32.s32 %v1148_v36 }
 0x1c8   : > { %6769 = vtanh.f32 %v853_v22  ;;  %v1163_v46 = vpop.xlane.xlu1 %1162 }
 0x1c9   : > { %v1152_v29 = vadd.s32 %v1151_v0, %v1149_v39  ;;  %v1164_v2 = vcvt.f32.s32 %v1163_v46  ;;  %v1195_v39 = vcvt.f32.s32 %v7335_v6 }
 0x1ca   : > { %v1178_v10 = vpop.xlane.xlu0 %1177 }
 0x1cb   : > { %v868_v19 = vpop.f32.mrb[4].mxu1  ;;  %vm1378_vm7 = vcmp.eq.s32.totalorder %v7104_v56, %v1152_v29  ;;  %v1167_v11 = vadd.s32 %v1166_v20, %v1164_v2  ;;  %v1179_v55 = vcvt.f32.s32 %v1178_v10 }
 0x1cc   : > { %v869_v45 = vadd.f32 %v868_v19, %v7426_v3  ;;  %v870_v51 = vpop.f32.mrb[5].mxu1  ;;  %v5863_v31 = vsel %vm1378_vm7, 1.0, %v6902_v37  ;;  %v1193_v36 = vpop.xlane.xlu1 %1192 }
 0x1cd   : > { %v872_v50 = vpop.f32.mrb[6].mxu1  ;;  %v7455_v63 = vadd.f32 %v870_v51, %v7428_v8  ;;  %vm1379_vm9 = vcmp.eq.s32.totalorder %v7104_v56, %v1167_v11  ;;  %v1182_v23 = vadd.s32 %v1181_v48, %v1179_v55 }
 0x1ce   : > { %v873_v61 = vadd.f32 %v872_v50, %v7426_v3  ;;  %v874_v47 = vpop.f32.mrb[7].mxu1  ;;  %6771 = vtanh.f32 %v869_v45  ;;  %v5864_v46 = vsel %vm1379_vm9, 1.0, %v6902_v37  ;;  %v1194_v50 = vcvt.f32.s32 %v1193_v36  ;;  %v1208_v20 = vpop.xlane.xlu0 %1207 }
 0x1cf   : > { %v6764_v57 = vpop.eup %6763  ;;  %v7458_v44 = vadd.f32 %v874_v47, %v7428_v8  ;;  %vm1380_vm10 = vcmp.eq.s32.totalorder %v7104_v56, %v1182_v23  ;;  %v1196_v47 = vshll.u32 %v1195_v39, 16  ;;  %v1209_v55 = vcvt.f32.s32 %v1208_v20 }
 0x1d0   : > { %v6766_v26 = vpop.eup %6765  ;;  %6773 = vtanh.f32 %v873_v61 }
 0x1d1   : > { %v6768_v5 = vpop.eup %6767  ;;  %v1197_v10 = vadd.s32 %v1196_v47, %v1194_v50 }
 0x1d2   : > { %v6770_v59 = vpop.eup %6769  ;;  %v7463_v62 = vpack.c.bf16 %v6768_v5, %v6764_v57  ;;  %v5865_v5 = vsel %vm1380_vm10, 1.0, %v6902_v37 }
 0x1d3   : > { %v878_v41 = vpop.f32.mrb[8].mxu1  ;;  %v7466_v17 = vpack.c.bf16 %v6770_v59, %v6766_v26  ;;  %vm1381_vm11 = vcmp.eq.s32.totalorder %v7104_v56, %v1197_v10 }
 0x1d4   : > { %v879_v54 = vadd.f32 %v878_v41, %v7426_v3  ;;  %v880_v40 = vpop.f32.mrb[9].mxu1 }
 0x1d5   : > { %v882_v28 = vpop.f32.mrb[10].mxu1  ;;  %6539 = vmatpush3.bf16.msra.mxu0 %v7466_v17  ;;  %v7472_v4 = vadd.f32 %v880_v40, %v7428_v8 }
 0x1d6   : > { %v883_v9 = vadd.f32 %v882_v28, %v7426_v3  ;;  %v884_v16 = vpop.f32.mrb[11].mxu1  ;;  %6775 = vtanh.f32 %v879_v54  ;;  %6540 = vmatprep.subr.bf16.mxu0 %v6900_v52  ;;  %v1210_v54 = vcvt.f32.s32 %v7337_v1  ;;  %v5866_v1 = vsel %vm1381_vm11, 1.0, %v6902_v37 }
 0x1d7   : > { %v7475_v22 = vadd.f32 %v884_v16, %v7428_v8 }
 0x1d8   : > { %6777 = vtanh.f32 %v883_v9  ;;  %6162 = vmatmul.mubr.msk.f32.vlgmr.msra.gmra.mrb[36].mxu0 %vm1426_vm8, %v5863_v31  ;;  %v6772_v19 = vpop.eup %6771  ;;  %v1211_v48 = vshll.u32 %v1210_v54, 16 }
 0x1d9   : > { %6542 = vmatpush3.bf16.msra.mxu0 %v7463_v62  ;;  %6168 = vmatprep.mubr.msk.f32.mxu0 %vm6901_vm6, %v6902_v37 }
 0x1da   : > { %v6774_v45 = vpop.eup %6773  ;;  %6543 = vmatprep.subr.bf16.mxu0 %v6900_v52  ;;  %v1212_v39 = vadd.s32 %v1211_v48, %v1209_v55  ;;  %v1238_v55 = vpop.xlane.xlu0 %1237 }
 0x1db   : > { %v888_v51 = vpop.f32.mrb[12].mxu1  ;;  %v6544_v61 = vpack.c.bf16 %v6774_v45, %v6772_v19 }
 0x1dc   : > { %v889_v0 = vadd.f32 %v888_v51, %v7426_v3  ;;  %v890_v27 = vpop.f32.mrb[13].mxu1  ;;  %6169 = vmatmul.mubr.msk.f32.vlgmr.msra.gmra.mrb[38].mxu0 %vm1426_vm8, %v5864_v46  ;;  %v1223_v51 = vpop.xlane.xlu1 %1222  ;;  %vm1382_vm12 = vcmp.eq.s32.totalorder %v7104_v56, %v1212_v39 }
 0x1dd   : > { %v892_v6 = vpop.f32.mrb[14].mxu1  ;;  %6545 = vmatpush3.bf16.msra.mxu0 %v6544_v61  ;;  %6593 = vmatpush3.bf16.xpose.msra.mxu1 %v6544_v61  ;;  %v7494_v29 = vadd.f32 %v890_v27, %v7428_v8 }
 0x1de   : > { %v893_v57 = vadd.f32 %v892_v6, %v7426_v3  ;;  %v894_v26 = vpop.f32.mrb[15].mxu1  ;;  %6779 = vtanh.f32 %v889_v0  ;;  %6175 = vmatprep.mubr.msk.f32.mxu0 %vm6901_vm6, %v6902_v37  ;;  %6546 = vmatprep.subr.bf16.mxu0 %v6900_v52  ;;  %v1225_v0 = vcvt.f32.s32 %v7345_v33  ;;  %v1224_v6 = vcvt.f32.s32 %v1223_v51 }
 0x1df   : > { %v7497_v2 = vadd.f32 %v894_v26, %v7428_v8  ;;  %6597 = vmatprep.subr.bf16.mxu1 %v6900_v52  ;;  %v5867_v33 = vsel %vm1382_vm12, 1.0, %v6902_v37  ;;  %vm5103_vm12 = vcmask 1043459  }
 0x1e0   : > { %6781 = vtanh.f32 %v893_v57  ;;  %v6776_v59 = vpop.eup %6775  ;;  %6176 = vmatmul.mubr.msk.f32.vlgmr.msra.gmra.mrb[40].mxu0 %vm1426_vm8, %v5865_v5  ;;  %v1226_v5 = vshll.u32 %v1225_v0, 16 }
 0x1e1   : > { %6182 = vmatprep.mubr.msk.f32.mxu0 %vm6901_vm6, %v6902_v37 }
 0x1e2   : > { %v6778_v41 = vpop.eup %6777  ;;  %v1227_v54 = vadd.s32 %v1226_v5, %v1224_v6 }
 0x1e3   : > { %v898_v40 = vpop.f32.mrb[16].mxu1  ;;  %v7510_v11 = vpack.c.bf16 %v6778_v41, %v6776_v59 }
 0x1e4   : > { %v899_v28 = vadd.f32 %v898_v40, %v7426_v3  ;;  %v900_v9 = vpop.f32.mrb[17].mxu1  ;;  %vm1383_vm13 = vcmp.eq.s32.totalorder %v7104_v56, %v1227_v54 }
 0x1e5   : > { %v902_v16 = vpop.f32.mrb[18].mxu1  ;;  %6548 = vmatpush3.bf16.msra.mxu0 %v7510_v11  ;;  %v7519_v36 = vadd.f32 %v900_v9, %v7428_v8 }
 0x1e6   : > { %v903_v31 = vadd.f32 %v902_v16, %v7426_v3  ;;  %v904_v23 = vpop.f32.mrb[19].mxu1  ;;  %6549 = vmatprep.subr.bf16.mxu0 %v6900_v52  ;;  %6783 = vtanh.f32 %v899_v28  ;;  %v1240_v16 = vcvt.f32.s32 %v7347_v7  ;;  %v5868_v7 = vsel %vm1383_vm13, 1.0, %v6902_v37 }
 0x1e7   : > { %v7522_v19 = vadd.f32 %v904_v23, %v7428_v8  ;;  %v1239_v23 = vcvt.f32.s32 %v1238_v55  ;;  %vm5106_vm13 = vcmask 1044484  }
 0x1e8   : > { %6785 = vtanh.f32 %v903_v31  ;;  %6183 = vmatmul.mubr.msk.f32.vlgmr.msra.gmra.mrb[42].mxu0 %vm1426_vm8, %v5866_v1  ;;  %v6780_v45 = vpop.eup %6779  ;;  %v1241_v51 = vshll.u32 %v1240_v16, 16 }
 0x1e9   : > { %6189 = vmatprep.mubr.msk.f32.mxu0 %vm6901_vm6, %v6902_v37 }
 0x1ea   : > { %v6782_v50 = vpop.eup %6781 }
 0x1eb   : > { %v908_v27 = vpop.f32.mrb[20].mxu1  ;;  %v7530_v61 = vpack.c.bf16 %v6782_v50, %v6780_v45 }
 0x1ec   : > { %v909_v47 = vadd.f32 %v908_v27, %v7426_v3  ;;  %v910_v57 = vpop.f32.mrb[21].mxu1 }
 0x1ed   : > { %v912_v26 = vpop.f32.mrb[22].mxu1  ;;  %6551 = vmatpush3.bf16.msra.mxu0 %v7530_v61  ;;  %v7539_v20 = vadd.f32 %v910_v57, %v7428_v8 }
 0x1ee   : > { %v913_v10 = vadd.f32 %v912_v26, %v7426_v3  ;;  %v914_v59 = vpop.f32.mrb[23].mxu1  ;;  %6552 = vmatprep.subr.bf16.mxu0 %v6900_v52  ;;  %6787 = vtanh.f32 %v909_v47  ;;  %v1242_v47 = vadd.s32 %v1241_v51, %v1239_v23  ;;  %v1253_v26 = vpop.xlane.xlu1 %1252 }
 0x1ef   : > { %v7542_v41 = vadd.f32 %v914_v59, %v7428_v8  ;;  %v1255_v59 = vcvt.f32.s32 %v7358_v12 }
 0x1f0   : > { %6789 = vtanh.f32 %v913_v10  ;;  %6190 = vmatmul.mubr.msk.f32.vlgmr.msra.gmra.mrb[44].mxu0 %vm1426_vm8, %v5867_v33  ;;  %v6784_v40 = vpop.eup %6783  ;;  %vm1384_vm14 = vcmp.eq.s32.totalorder %v7104_v56, %v1242_v47 }
 0x1f1   : > { %6196 = vmatprep.mubr.msk.f32.mxu0 %vm6901_vm6, %v6902_v37  ;;  %v5869_v12 = vsel %vm1384_vm14, 1.0, %v6902_v37  ;;  %vm5109_vm14 = vcmask 1045509  }
 0x1f2   : > { %v6786_v9 = vpop.eup %6785 }
 0x1f3   : > { %v918_v48 = vpop.f32.mrb[24].mxu1  ;;  %v7550_v31 = vpack.c.bf16 %v6786_v9, %v6784_v40  ;;  %v1254_v40 = vcvt.f32.s32 %v1253_v26 }
 0x1f4   : > { %v919_v1 = vadd.f32 %v918_v48, %v7426_v3  ;;  %v920_v39 = vpop.f32.mrb[25].mxu1  ;;  %v1256_v48 = vshll.u32 %v1255_v59, 16 }
 0x1f5   : > { %v922_v45 = vpop.f32.mrb[26].mxu1  ;;  %6554 = vmatpush3.bf16.msra.mxu0 %v7550_v31  ;;  %v7559_v27 = vadd.f32 %v920_v39, %v7428_v8 }
 0x1f6   : > { %v923_v50 = vadd.f32 %v922_v45, %v7426_v3  ;;  %v924_v0 = vpop.f32.mrb[27].mxu1  ;;  %6555 = vmatprep.subr.bf16.mxu0 %v6900_v52  ;;  %6791 = vtanh.f32 %v919_v1  ;;  %v1257_v51 = vadd.s32 %v1256_v48, %v1254_v40 }
 0x1f7   : > { %v7562_v6 = vadd.f32 %v924_v0, %v7428_v8  ;;  %v1268_v0 = vpop.xlane.xlu0 %1267 }
 0x1f8   : > { %6793 = vtanh.f32 %v923_v50  ;;  %6197 = vmatmul.mubr.msk.f32.vlgmr.msra.gmra.mrb[46].mxu0 %vm1426_vm8, %v5868_v7  ;;  %v6788_v57 = vpop.eup %6787  ;;  %vm1385_vm15 = vcmp.eq.s32.totalorder %v7104_v56, %v1257_v51  ;;  %v1269_v59 = vcvt.f32.s32 %v1268_v0 }
 0x1f9   : > { %6203 = vmatprep.mubr.msk.f32.mxu0 %vm6901_vm6, %v6902_v37 }
 0x1fa   : > { %v6790_v10 = vpop.eup %6789 }
 0x1fb   : > { %v928_v33 = vpop.f32.mrb[28].mxu1  ;;  %v7570_v54 = vpack.c.bf16 %v6790_v10, %v6788_v57  ;;  %v1270_v57 = vcvt.f32.s32 %v7360_v35  ;;  %v5870_v35 = vsel %vm1385_vm15, 1.0, %v6902_v37  ;;  %vm5112_vm15 = vcmask 1046534  }
 0x1fc   : > { %v929_v55 = vadd.f32 %v928_v33, %v7426_v3  ;;  %v930_v9 = vpop.f32.mrb[29].mxu1 }
 0x1fd   : > { %v932_v16 = vpop.f32.mrb[30].mxu1  ;;  %6557 = vmatpush3.bf16.msra.mxu0 %v7570_v54  ;;  %v7579_v39 = vadd.f32 %v930_v9, %v7428_v8  ;;  %v1271_v9 = vshll.u32 %v1270_v57, 16  ;;  %v1285_v57 = vcvt.f32.s32 %v7368_v38 }
 0x1fe   : > { %v933_v23 = vadd.f32 %v932_v16, %v7426_v3  ;;  %v934_v1 = vpop.f32.mrb[31].mxu1  ;;  %6558 = vmatprep.subr.bf16.mxu0 %v6900_v52  ;;  %6795 = vtanh.f32 %v929_v55 }
 0x1ff   : > { %v7582_v45 = vadd.f32 %v934_v1, %v7428_v8 }
 0x200   : > { %6797 = vtanh.f32 %v933_v23  ;;  %6204 = vmatmul.mubr.msk.f32.vlgmr.msra.gmra.mrb[48].mxu0 %vm1426_vm8, %v5869_v12  ;;  %v6792_v50 = vpop.eup %6791  ;;  %v1272_v12 = vadd.s32 %v1271_v9, %v1269_v59 }
 0x201   : > { %6210 = vmatprep.mubr.msk.f32.mxu0 %vm6901_vm6, %v6902_v37 }
 0x202   : > { %v6794_v47 = vpop.eup %6793  ;;  %vm1386_vm2 = vcmp.eq.s32.totalorder %v7104_v56, %v1272_v12 }
 0x203   : > { %v938_v26 = vpop.f32.mrb[32].mxu1  ;;  %v7590_v10 = vpack.c.bf16 %v6794_v47, %v6792_v50  ;;  %v1283_v50 = vpop.xlane.xlu1 %1282  ;;  %v5871_v38 = vsel %vm1386_vm2, 1.0, %v6902_v37  ;;  %vm5115_vm2 = vcmask 1047559  }
 0x204   : > { %v939_v33 = vadd.f32 %v938_v26, %v7426_v3  ;;  %v940_v40 = vpop.f32.mrb[33].mxu1  ;;  %v1284_v59 = vcvt.f32.s32 %v1283_v50 }
 0x205   : > { %v942_v55 = vpop.f32.mrb[34].mxu1  ;;  %6560 = vmatpush3.bf16.msra.mxu0 %v7590_v10  ;;  %v7599_v23 = vadd.f32 %v940_v40, %v7428_v8 }
 0x206   : > { %v943_v16 = vadd.f32 %v942_v55, %v7426_v3  ;;  %v944_v48 = vpop.f32.mrb[35].mxu1  ;;  %6561 = vmatprep.subr.bf16.mxu0 %v6900_v52  ;;  %6799 = vtanh.f32 %v939_v33 }
 0x207   : > { %v7602_v1 = vadd.f32 %v944_v48, %v7428_v8 }
 0x208   : > { %6801 = vtanh.f32 %v943_v16  ;;  %6211 = vmatmul.mubr.msk.f32.vlgmr.msra.gmra.mrb[50].mxu0 %vm1426_vm8, %v5870_v35  ;;  %v6796_v51 = vpop.eup %6795  ;;  %v1286_v16 = vshll.u32 %v1285_v57, 16  ;;  %v1298_v57 = vpop.xlane.xlu0 %1297 }
 0x209   : > { %6217 = vmatprep.mubr.msk.f32.mxu0 %vm6901_vm6, %v6902_v37 }
 0x20a   : > { %v6798_v47 = vpop.eup %6797  ;;  %v1287_v50 = vadd.s32 %v1286_v16, %v1284_v59  ;;  %v1299_v59 = vcvt.f32.s32 %v1298_v57 }
 0x20b   : > { %v948_v26 = vpop.f32.mrb[36].mxu1  ;;  %v7610_v33 = vpack.c.bf16 %v6798_v47, %v6796_v51 }
 0x20c   : > { %v949_v40 = vadd.f32 %v948_v26, %v7426_v3  ;;  %v950_v55 = vpop.f32.mrb[37].mxu1  ;;  %vm1387_vm3 = vcmp.eq.s32.totalorder %v7104_v56, %v1287_v50 }
 0x20d   : > { %v952_v9 = vpop.f32.mrb[38].mxu1  ;;  %6563 = vmatpush3.bf16.msra.mxu0 %v7610_v33  ;;  %v7619_v51 = vadd.f32 %v950_v55, %v7428_v8 }
 0x20e   : > { %v953_v48 = vadd.f32 %v952_v9, %v7426_v3  ;;  %v954_v35 = vpop.f32.mrb[39].mxu1  ;;  %6564 = vmatprep.subr.bf16.mxu0 %v6900_v52  ;;  %6803 = vtanh.f32 %v949_v40  ;;  %v1300_v40 = vcvt.f32.s32 %v7370_v49  ;;  %v5872_v49 = vsel %vm1387_vm3, 1.0, %v6902_v37 }
 0x20f   : > { %v7622_v12 = vadd.f32 %v954_v35, %v7428_v8  ;;  %vm5709_vm3 = vcmask 24576  }
 0x210   : > { %6805 = vtanh.f32 %v953_v48  ;;  %6218 = vmatmul.mubr.msk.f32.vlgmr.msra.gmra.mrb[52].mxu0 %vm1426_vm8, %v5871_v38  ;;  %v6800_v47 = vpop.eup %6799  ;;  %v1301_v38 = vshll.u32 %v1300_v40, 16  ;;  %v1313_v40 = vpop.xlane.xlu1 %1312 }
 0x211   : > { %6224 = vmatprep.mubr.msk.f32.mxu0 %vm6901_vm6, %v6902_v37 }
 0x212   : > { %v6802_v9 = vpop.eup %6801  ;;  %v1302_v57 = vadd.s32 %v1301_v38, %v1299_v59 }
 0x213   : > { %v958_v55 = vpop.f32.mrb[40].mxu1  ;;  %v7630_v0 = vpack.c.bf16 %v6802_v9, %v6800_v47 }
 0x214   : > { %v959_v16 = vadd.f32 %v958_v55, %v7426_v3  ;;  %v960_v48 = vpop.f32.mrb[41].mxu1  ;;  %vm1388_vm4 = vcmp.eq.s32.totalorder %v7104_v56, %v1302_v57 }
 0x215   : > { %v962_v35 = vpop.f32.mrb[42].mxu1  ;;  %6566 = vmatpush3.bf16.msra.mxu0 %v7630_v0  ;;  %v7639_v47 = vadd.f32 %v960_v48, %v7428_v8 }
 0x216   : > { %v963_v26 = vadd.f32 %v962_v35, %v7426_v3  ;;  %v964_v7 = vpop.f32.mrb[43].mxu1  ;;  %6567 = vmatprep.subr.bf16.mxu0 %v6900_v52  ;;  %6807 = vtanh.f32 %v959_v16  ;;  %v1315_v16 = vcvt.f32.s32 %v7381_v21  ;;  %v5873_v21 = vsel %vm1388_vm4, 1.0, %v6902_v37 }
 0x217   : > { %v7642_v50 = vadd.f32 %v964_v7, %v7428_v8  ;;  %v1314_v7 = vcvt.f32.s32 %v1313_v40 }
 0x218   : > { %6809 = vtanh.f32 %v963_v26  ;;  %6225 = vmatmul.mubr.msk.f32.vlgmr.msra.gmra.mrb[54].mxu0 %vm1426_vm8, %v5872_v49  ;;  %v6804_v9 = vpop.eup %6803  ;;  %v1316_v49 = vshll.u32 %v1315_v16, 16  ;;  %v1328_v16 = vpop.xlane.xlu0 %1327 }
 0x219   : > { %6231 = vmatprep.mubr.msk.f32.mxu0 %vm6901_vm6, %v6902_v37 }
 0x21a   : > { %v6806_v35 = vpop.eup %6805  ;;  %v1317_v40 = vadd.s32 %v1316_v49, %v1314_v7 }
 0x21b   : > { %v968_v48 = vpop.f32.mrb[44].mxu1  ;;  %v7650_v5 = vpack.c.bf16 %v6806_v35, %v6804_v9 }
 0x21c   : > { %v969_v26 = vadd.f32 %v968_v48, %v7426_v3  ;;  %v970_v59 = vpop.f32.mrb[45].mxu1  ;;  %vm1389_vm5 = vcmp.eq.s32.totalorder %v7104_v56, %v1317_v40 }
 0x21d   : > { %v972_v38 = vpop.f32.mrb[46].mxu1  ;;  %6569 = vmatpush3.bf16.msra.mxu0 %v7650_v5  ;;  %v7659_v9 = vadd.f32 %v970_v59, %v7428_v8 }
 0x21e   : > { %v973_v55 = vadd.f32 %v972_v38, %v7426_v3  ;;  %v974_v28 = vpop.f32.mrb[47].mxu1  ;;  %6570 = vmatprep.subr.bf16.mxu0 %v6900_v52  ;;  %6811 = vtanh.f32 %v969_v26  ;;  %v1330_v26 = vcvt.f32.s32 %v7383_v53  ;;  %v5874_v53 = vsel %vm1389_vm5, 1.0, %v6902_v37 }
 0x21f   : > { %v7662_v57 = vadd.f32 %v974_v28, %v7428_v8  ;;  %v1329_v28 = vcvt.f32.s32 %v1328_v16 }
 0x220   : > { %6813 = vtanh.f32 %v973_v55  ;;  %6232 = vmatmul.mubr.msk.f32.vlgmr.msra.gmra.mrb[56].mxu0 %vm1426_vm8, %v5873_v21  ;;  %v6808_v35 = vpop.eup %6807  ;;  %v1331_v21 = vshll.u32 %v1330_v26, 16  ;;  %v1343_v26 = vpop.xlane.xlu1 %1342 }
 0x221   : > { %6238 = vmatprep.mubr.msk.f32.mxu0 %vm6901_vm6, %v6902_v37 }
 0x222   : > { %v6810_v38 = vpop.eup %6809  ;;  %v1332_v16 = vadd.s32 %v1331_v21, %v1329_v28 }
 0x223   : > { %v978_v59 = vpop.f32.mrb[48].mxu1  ;;  %v7670_v46 = vpack.c.bf16 %v6810_v38, %v6808_v35 }
 0x224   : > { %v979_v55 = vadd.f32 %v978_v59, %v7426_v3  ;;  %v980_v7 = vpop.f32.mrb[49].mxu1  ;;  %vm1390_vm7 = vcmp.eq.s32.totalorder %v7104_v56, %v1332_v16 }
 0x225   : > { %v982_v49 = vpop.f32.mrb[50].mxu1  ;;  %6572 = vmatpush3.bf16.msra.mxu0 %v7670_v46  ;;  %v7679_v35 = vadd.f32 %v980_v7, %v7428_v8 }
 0x226   : > { %v983_v48 = vadd.f32 %v982_v49, %v7426_v3  ;;  %v984_v14 = vpop.f32.mrb[51].mxu1  ;;  %6573 = vmatprep.subr.bf16.mxu0 %v6900_v52  ;;  %6815 = vtanh.f32 %v979_v55  ;;  %v1345_v55 = vcvt.f32.s32 %v7391_v24  ;;  %v5875_v24 = vsel %vm1390_vm7, 1.0, %v6902_v37 }
 0x227   : > { %v7682_v40 = vadd.f32 %v984_v14, %v7428_v8  ;;  %v1344_v14 = vcvt.f32.s32 %v1343_v26 }
 0x228   : > { %6817 = vtanh.f32 %v983_v48  ;;  %6239 = vmatmul.mubr.msk.f32.vlgmr.msra.gmra.mrb[58].mxu0 %vm1426_vm8, %v5874_v53  ;;  %v6812_v38 = vpop.eup %6811  ;;  %v1346_v53 = vshll.u32 %v1345_v55, 16  ;;  %v1358_v55 = vpop.xlane.xlu0 %1357 }
 0x229   : > { %6245 = vmatprep.mubr.msk.f32.mxu0 %vm6901_vm6, %v6902_v37 }
 0x22a   : > { %v6814_v49 = vpop.eup %6813  ;;  %v1347_v26 = vadd.s32 %v1346_v53, %v1344_v14 }
 0x22b   : > { %v988_v7 = vpop.f32.mrb[52].mxu1  ;;  %v7690_v42 = vpack.c.bf16 %v6814_v49, %v6812_v38 }
 0x22c   : > { %v989_v48 = vadd.f32 %v988_v7, %v7426_v3  ;;  %v990_v28 = vpop.f32.mrb[53].mxu1  ;;  %vm1391_vm9 = vcmp.eq.s32.totalorder %v7104_v56, %v1347_v26 }
 0x22d   : > { %v992_v21 = vpop.f32.mrb[54].mxu1  ;;  %6575 = vmatpush3.bf16.msra.mxu0 %v7690_v42  ;;  %v7699_v38 = vadd.f32 %v990_v28, %v7428_v8 }
 0x22e   : > { %v993_v59 = vadd.f32 %v992_v21, %v7426_v3  ;;  %v994_v58 = vpop.f32.mrb[55].mxu1  ;;  %6576 = vmatprep.subr.bf16.mxu0 %v6900_v52  ;;  %6819 = vtanh.f32 %v989_v48  ;;  %v1360_v48 = vcvt.f32.s32 %v7393_v60  ;;  %v5876_v60 = vsel %vm1391_vm9, 1.0, %v6902_v37 }
 0x22f   : > { %v7702_v16 = vadd.f32 %v994_v58, %v7428_v8  ;;  %v1359_v58 = vcvt.f32.s32 %v1358_v55 }
 0x230   : > { %6821 = vtanh.f32 %v993_v59  ;;  %6246 = vmatmul.mubr.msk.f32.vlgmr.msra.gmra.mrb[60].mxu0 %vm1426_vm8, %v5875_v24  ;;  %v6816_v49 = vpop.eup %6815  ;;  %v1361_v24 = vshll.u32 %v1360_v48, 16  ;;  %v1373_v48 = vpop.xlane.xlu1 %1372 }
 0x231   : > { %6252 = vmatprep.mubr.msk.f32.mxu0 %vm6901_vm6, %v6902_v37 }
 0x232   : > { %v6818_v21 = vpop.eup %6817  ;;  %v1362_v55 = vadd.s32 %v1361_v24, %v1359_v58 }
 0x233   : > { %v998_v28 = vpop.f32.mrb[56].mxu1  ;;  %v7710_v18 = vpack.c.bf16 %v6818_v21, %v6816_v49 }
 0x234   : > { %v999_v59 = vadd.f32 %v998_v28, %v7426_v3  ;;  %v1000_v14 = vpop.f32.mrb[57].mxu1  ;;  %vm1392_vm10 = vcmp.eq.s32.totalorder %v7104_v56, %v1362_v55 }
 0x235   : > { %v1002_v53 = vpop.f32.mrb[58].mxu1  ;;  %6578 = vmatpush3.bf16.msra.mxu0 %v7710_v18  ;;  %v7719_v49 = vadd.f32 %v1000_v14, %v7428_v8 }
 0x236   : > { %v1003_v7 = vadd.f32 %v1002_v53, %v7426_v3  ;;  %v1004_v32 = vpop.f32.mrb[59].mxu1  ;;  %6579 = vmatprep.subr.bf16.mxu0 %v6900_v52  ;;  %6823 = vtanh.f32 %v999_v59  ;;  %v1375_v59 = vcvt.f32.s32 %v7403_v13 }
 0x237   : > { %v7722_v26 = vadd.f32 %v1004_v32, %v7428_v8  ;;  %v1374_v8 = vcvt.f32.s32 %v1373_v48 }
 0x238   : > { %6825 = vtanh.f32 %v1003_v7  ;;  %6253 = vmatmul.mubr.msk.f32.vlgmr.msra.gmra.mrb[62].mxu0 %vm1426_vm8, %v5876_v60  ;;  %v6820_v21 = vpop.eup %6819  ;;  %v1376_v32 = vshll.u32 %v1375_v59, 16  ;;  %v5877_v7 = vsel %vm1392_vm10, 1.0, %v6902_v37 }
 0x239   : > { %v6679_v3 = vpack.c.bf16 %v7722_v26, %v7719_v49  ;;  %6259 = vmatprep.mubr.msk.f32.mxu0 %vm6901_vm6, %v6902_v37  ;;  %v5077_v49 = vld [vmem:[%s8314_s4 + $0x8] sm:$0xff] }
 0x23a   : > { %v6822_v28 = vpop.eup %6821  ;;  %v1377_v58 = vadd.s32 %v1376_v32, %v1374_v8 }
 0x23b   : > { %v7730_v14 = vpack.c.bf16 %v6822_v28, %v6820_v21 }
 0x23c   : > { %vm1393_vm11 = vcmp.eq.s32.totalorder %v7104_v56, %v1377_v58 }
 0x23d   : > { %6581 = vmatpush3.bf16.msra.mxu0 %v7730_v14  ;;  %v5878_v60 = vsel %vm1393_vm11, 1.0, %v6902_v37 }
 0x23e   : > { %6582 = vmatprep.subr.bf16.mxu0 %v6900_v52 }
 0x240   : > { %6260 = vmatmul.mubr.msk.f32.vlgmr.msra.gmra.mrb[64].mxu0 %vm1426_vm8, %v5877_v7  ;;  %v6824_v53 = vpop.eup %6823 }
 0x241   : > { %6266 = vmatprep.mubr.msk.f32.mxu0 %vm6901_vm6, %v6902_v37 }
 0x242   : > { %v6826_v13 = vpop.eup %6825 }
 0x243   : > { %v7739_v24 = vpack.c.bf16 %v6826_v13, %v6824_v53 }
 0x245   : > { %6584 = vmatpush3.bf16.msra.mxu0 %v7739_v24 }
 0x246   : > { %6585 = vmatprep.subr.bf16.mxu0 %v6900_v52 }
 0x248   : > { %6267 = vmatmul.mubr.msk.f32.vlgmr.msra.gmra.mrb[66].mxu0 %vm1426_vm8, %v5878_v60 }
 0x249   : > { %6273 = vmatprep.mubr.msk.f32.mxu0 %vm6901_vm6, %v6902_v37 }
 0x24e   : > { %6587 = vmatpush3.bf16.xpose.msra.mxu0 %v7466_v17 }
 0x24f   : > { %6588 = vmatprep.subr.bf16.mxu0 %v6900_v52 }
 0x2ab   : > { %v1496_v55 = vpop.f32.mrb[36].mxu0 }
 0x2ac   : > { %v6163_v21 = vpop.f32.mrb[37].mxu0  ;;  %6274 = vmatmul.mubr.f32.vlgmr.msra.gmra.mrb[68].mxu0 %v1496_v55 }
 0x2ad   : > { %6590 = vmatpush3.bf16.xpose.msra.mxu0 %v7463_v62  ;;  %6280 = vmatprep.mubr.msk.f32.mxu0 %vm6901_vm6, %v6902_v37 }
 0x2ae   : > { %6594 = vmatprep.subr.bf16.mxu0 %v6900_v52 }
 0x2af   : > { %v1569_v56 = vpop.f32.mrb[38].mxu0 }
 0x2b0   : > { %v6170_v48 = vpop.f32.mrb[39].mxu0 }
 0x2b3   : > { %v1642_v28 = vpop.f32.mrb[40].mxu0 }
 0x2b4   : > { %6281 = vmatmul.mubr.f32.vlgmr.msra.gmra.mrb[70].mxu0 %v1569_v56  ;;  %v6177_v59 = vpop.f32.mrb[41].mxu0  ;;  %6288 = vmatmul.mubr.f32.vlgmr.msra.gmra.mrb[60].mxu1 %v1642_v28 }
 0x2b5   : > { %6596 = vmatpush3.bf16.xpose.msra.mxu0 %v7510_v11  ;;  %6599 = vmatpush3.bf16.xpose.msra.mxu1 %v7530_v61 }
 0x2b6   : > { %6294 = vmatprep.mubr.msk.f32.mxu0 %vm6901_vm6, %v6902_v37  ;;  %6600 = vmatprep.subr.bf16.mxu0 %v6900_v52 }
 0x2b7   : > { %6301 = vmatprep.mubr.msk.f32.mxu1 %vm6901_vm6, %v6902_v37  ;;  %6603 = vmatprep.subr.bf16.mxu1 %v6900_v52 }
 0x2bb   : > { %v1715_v62 = vpop.f32.mrb[42].mxu0 }
 0x2bc   : > { %v6184_v17 = vpop.f32.mrb[43].mxu0  ;;  %6295 = vmatmul.mubr.f32.vlgmr.msra.gmra.mrb[72].mxu0 %v1715_v62 }
 0x2bd   : > { %6602 = vmatpush3.bf16.xpose.msra.mxu0 %v7550_v31  ;;  %6308 = vmatprep.mubr.msk.f32.mxu0 %vm6901_vm6, %v6902_v37 }
 0x2be   : > { %6606 = vmatprep.subr.bf16.mxu0 %v6900_v52 }
 0x2c3   : > { %v1788_v11 = vpop.f32.mrb[44].mxu0 }
 0x2c4   : > { %v6191_v61 = vpop.f32.mrb[45].mxu0  ;;  %6302 = vmatmul.mubr.f32.vlgmr.msra.gmra.mrb[62].mxu1 %v1788_v11 }
 0x2c5   : > { %6605 = vmatpush3.bf16.xpose.msra.mxu1 %v7570_v54  ;;  %6315 = vmatprep.mubr.msk.f32.mxu1 %vm6901_vm6, %v6902_v37 }
 0x2c6   : > { %6609 = vmatprep.subr.bf16.mxu1 %v6900_v52 }
 0x2cb   : > { %v1861_v8 = vpop.f32.mrb[46].mxu0 }
 0x2cc   : > { %v6198_v32 = vpop.f32.mrb[47].mxu0  ;;  %6309 = vmatmul.mubr.f32.vlgmr.msra.gmra.mrb[74].mxu0 %v1861_v8 }
 0x2cd   : > { %6608 = vmatpush3.bf16.xpose.msra.mxu0 %v7590_v10  ;;  %6322 = vmatprep.mubr.msk.f32.mxu0 %vm6901_vm6, %v6902_v37 }
 0x2ce   : > { %6612 = vmatprep.subr.bf16.mxu0 %v6900_v52 }
 0x2d3   : > { %v1934_v31 = vpop.f32.mrb[48].mxu0 }
 0x2d4   : > { %v6205_v7 = vpop.f32.mrb[49].mxu0  ;;  %6316 = vmatmul.mubr.f32.vlgmr.msra.gmra.mrb[64].mxu1 %v1934_v31 }
 0x2d5   : > { %6611 = vmatpush3.bf16.xpose.msra.mxu1 %v7610_v33  ;;  %6329 = vmatprep.mubr.msk.f32.mxu1 %vm6901_vm6, %v6902_v37 }
 0x2d6   : > { %6615 = vmatprep.subr.bf16.mxu1 %v6900_v52 }
 0x2db   : > { %v2007_v54 = vpop.f32.mrb[50].mxu0 }
 0x2dc   : > { %v6212_v58 = vpop.f32.mrb[51].mxu0  ;;  %6323 = vmatmul.mubr.f32.vlgmr.msra.gmra.mrb[76].mxu0 %v2007_v54 }
 0x2dd   : > { %6614 = vmatpush3.bf16.xpose.msra.mxu0 %v7630_v0  ;;  %6336 = vmatprep.mubr.msk.f32.mxu0 %vm6901_vm6, %v6902_v37 }
 0x2de   : > { %6618 = vmatprep.subr.bf16.mxu0 %v6900_v52 }
 0x2e3   : > { %v2080_v10 = vpop.f32.mrb[52].mxu0 }
 0x2e4   : > { %v6219_v53 = vpop.f32.mrb[53].mxu0  ;;  %6330 = vmatmul.mubr.f32.vlgmr.msra.gmra.mrb[66].mxu1 %v2080_v10 }
 0x2e5   : > { %6617 = vmatpush3.bf16.xpose.msra.mxu1 %v7650_v5  ;;  %6343 = vmatprep.mubr.msk.f32.mxu1 %vm6901_vm6, %v6902_v37 }
 0x2e6   : > { %6621 = vmatprep.subr.bf16.mxu1 %v6900_v52 }
 0x2eb   : > { %v2153_v33 = vpop.f32.mrb[54].mxu0 }
 0x2ec   : > { %v6226_v13 = vpop.f32.mrb[55].mxu0  ;;  %6337 = vmatmul.mubr.f32.vlgmr.msra.gmra.mrb[78].mxu0 %v2153_v33 }
 0x2ed   : > { %6620 = vmatpush3.bf16.xpose.msra.mxu0 %v7670_v46  ;;  %6350 = vmatprep.mubr.msk.f32.mxu0 %vm6901_vm6, %v6902_v37 }
 0x2ee   : > { %6624 = vmatprep.subr.bf16.mxu0 %v6900_v52 }
 0x2f3   : > { %v2226_v0 = vpop.f32.mrb[56].mxu0 }
 0x2f4   : > { %v6233_v60 = vpop.f32.mrb[57].mxu0  ;;  %6344 = vmatmul.mubr.f32.vlgmr.msra.gmra.mrb[68].mxu1 %v2226_v0 }
 0x2f5   : > { %6623 = vmatpush3.bf16.xpose.msra.mxu1 %v7690_v42  ;;  %6357 = vmatprep.mubr.msk.f32.mxu1 %vm6901_vm6, %v6902_v37 }
 0x2f6   : > { %6627 = vmatprep.subr.bf16.mxu1 %v6900_v52 }
 0x2fb   : > { %v2299_v5 = vpop.f32.mrb[58].mxu0 }
 0x2fc   : > { %v6240_v55 = vpop.f32.mrb[59].mxu0  ;;  %6351 = vmatmul.mubr.f32.vlgmr.msra.gmra.mrb[80].mxu0 %v2299_v5 }
 0x2fd   : > { %6626 = vmatpush3.bf16.xpose.msra.mxu0 %v7710_v18  ;;  %6364 = vmatprep.mubr.msk.f32.mxu0 %vm6901_vm6, %v6902_v37 }
 0x2fe   : > { %6630 = vmatprep.subr.bf16.mxu0 %v6900_v52 }
 0x303   : > { %v2372_v46 = vpop.f32.mrb[60].mxu0 }
 0x304   : > { %v6247_v21 = vpop.f32.mrb[61].mxu0  ;;  %6358 = vmatmul.mubr.f32.vlgmr.msra.gmra.mrb[70].mxu1 %v2372_v46 }
 0x305   : > { %6629 = vmatpush3.bf16.xpose.msra.mxu1 %v7730_v14  ;;  %6371 = vmatprep.mubr.msk.f32.mxu1 %vm6901_vm6, %v6902_v37  ;;  %v8319_v14 = vpack.c.bf16 %v7444_v15, %v7438_v30 }
 0x306   : > { %6633 = vmatprep.subr.bf16.mxu1 %v6900_v52 }
 0x30b   : > { %v2445_v42 = vpop.f32.mrb[62].mxu0 }
 0x30c   : > { %v6254_v56 = vpop.f32.mrb[63].mxu0  ;;  %6365 = vmatmul.mubr.f32.vlgmr.msra.gmra.mrb[82].mxu0 %v2445_v42 }
 0x30d   : > { %6632 = vmatpush3.bf16.xpose.msra.mxu0 %v7739_v24  ;;  %6378 = vmatprep.mubr.msk.f32.mxu0 %vm6901_vm6, %v6902_v37  ;;  %v8320_v24 = vpack.c.bf16 %v7441_v43, %v7433_v34 }
 0x30e   : > { %6636 = vmatprep.subr.bf16.mxu0 %v6900_v52 }
 0x313   : > { %v2518_v18 = vpop.f32.mrb[64].mxu0 }
 0x314   : > { %v6261_v48 = vpop.f32.mrb[65].mxu0  ;;  %6372 = vmatmul.mubr.f32.vlgmr.msra.gmra.mrb[72].mxu1 %v2518_v18 }
 0x315   : > { %6635 = vmatpush3.bf16.msra.mxu1 %v8319_v14  ;;  %6385 = vmatprep.mubr.msk.f32.mxu1 %vm6901_vm6, %v6902_v37 }
 0x316   : > { %6639 = vmatprep.subr.bf16.mxu1 %v6900_v52 }
 0x31b   : > { %v2591_v28 = vpop.f32.mrb[66].mxu0 }
 0x31c   : > { %v6268_v59 = vpop.f32.mrb[67].mxu0  ;;  %6379 = vmatmul.mubr.f32.vlgmr.msra.gmra.mrb[84].mxu0 %v2591_v28 }
 0x31d   : > { %6638 = vmatpush3.bf16.msra.mxu0 %v8320_v24  ;;  %6392 = vmatprep.mubr.msk.f32.mxu0 %vm6901_vm6, %v6902_v37 }
 0x31e   : > { %6642 = vmatprep.subr.bf16.mxu0 %v6900_v52 }
 0x37f   : > { %v2661_v62 = vpop.f32.mrb[68].mxu0 }
 0x380   : > { %v7818_v30 = vmul.f32 0.088388346, %v2661_v62  ;;  %v6275_v15 = vpop.f32.mrb[69].mxu0 }
 0x382   : > { %v3731_v17 = vsel %vm1057_vm0, %v7818_v30, -inf }
 0x383   : > { %3732 = vmax.xlane.f32.xlu0 %v3731_v17 }
 0x387   : > { %v2731_v11 = vpop.f32.mrb[70].mxu0  ;;  %v2801_v61 = vpop.f32.mrb[60].mxu1 }
 0x388   : > { %v7822_v8 = vmul.f32 0.088388346, %v2731_v11  ;;  %v6282_v32 = vpop.f32.mrb[71].mxu0  ;;  %v7824_v34 = vmul.f32 0.088388346, %v2801_v61  ;;  %v6289_v43 = vpop.f32.mrb[61].mxu1 }
 0x38a   : > { %v3734_v31 = vsel %vm1057_vm0, %v7822_v8, -inf  ;;  %v3737_v7 = vsel %vm1057_vm0, %v7824_v34, -inf }
 0x38b   : > { %3735 = vmax.xlane.f32.xlu1 %v3734_v31  ;;  %3738 = vmax.xlane.f32.xlu0 %v3737_v7 }
 0x38f   : > { %v2871_v54 = vpop.f32.mrb[72].mxu0 }
 0x390   : > { %v7830_v58 = vmul.f32 0.088388346, %v2871_v54  ;;  %v6296_v10 = vpop.f32.mrb[73].mxu0 }
 0x392   : > { %v3740_v53 = vsel %vm1057_vm0, %v7830_v58, -inf }
 0x393   : > { %3741 = vmax.xlane.f32.xlu1 %v3740_v53 }
 0x397   : > { %v2941_v33 = vpop.f32.mrb[62].mxu1 }
 0x398   : > { %v7834_v13 = vmul.f32 0.088388346, %v2941_v33  ;;  %v6303_v0 = vpop.f32.mrb[63].mxu1 }
 0x39a   : > { %v3743_v60 = vsel %vm1057_vm0, %v7834_v13, -inf }
 0x39b   : > { %3744 = vmax.xlane.f32.xlu0 %v3743_v60 }
 0x39f   : > { %v3011_v5 = vpop.f32.mrb[74].mxu0 }
 0x3a0   : > { %v7838_v55 = vmul.f32 0.088388346, %v3011_v5  ;;  %v6310_v46 = vpop.f32.mrb[75].mxu0 }
 0x3a2   : > { %v3746_v21 = vsel %vm1057_vm0, %v7838_v55, -inf }
 0x3a3   : > { %3747 = vmax.xlane.f32.xlu1 %v3746_v21 }
 0x3a7   : > { %v3081_v42 = vpop.f32.mrb[64].mxu1 }
 0x3a8   : > { %v7842_v56 = vmul.f32 0.088388346, %v3081_v42  ;;  %v6317_v18 = vpop.f32.mrb[65].mxu1 }
 0x3aa   : > { %v3749_v48 = vsel %vm1057_vm0, %v7842_v56, -inf }
 0x3ab   : > { %3750 = vmax.xlane.f32.xlu0 %v3749_v48 }
 0x3af   : > { %v3151_v14 = vpop.f32.mrb[76].mxu0 }
 0x3b0   : > { %v7846_v28 = vmul.f32 0.088388346, %v3151_v14  ;;  %v6324_v59 = vpop.f32.mrb[77].mxu0 }
 0x3b2   : > { %v3752_v24 = vsel %vm1057_vm0, %v7846_v28, -inf }
 0x3b3   : > { %3753 = vmax.xlane.f32.xlu1 %v3752_v24 }
 0x3b7   : > { %v3221_v62 = vpop.f32.mrb[66].mxu1 }
 0x3b8   : > { %v7850_v15 = vmul.f32 0.088388346, %v3221_v62  ;;  %v6331_v17 = vpop.f32.mrb[67].mxu1 }
 0x3ba   : > { %v3755_v11 = vsel %vm1057_vm0, %v7850_v15, -inf }
 0x3bb   : > { %3756 = vmax.xlane.f32.xlu0 %v3755_v11 }
 0x3bf   : > { %v3291_v61 = vpop.f32.mrb[78].mxu0 }
 0x3c0   : > { %v7854_v32 = vmul.f32 0.088388346, %v3291_v61  ;;  %v6338_v43 = vpop.f32.mrb[79].mxu0 }
 0x3c2   : > { %v3758_v31 = vsel %vm1057_vm0, %v7854_v32, -inf }
 0x3c3   : > { %3759 = vmax.xlane.f32.xlu1 %v3758_v31 }
 0x3c7   : > { %v3361_v7 = vpop.f32.mrb[68].mxu1 }
 0x3c8   : > { %v7858_v54 = vmul.f32 0.088388346, %v3361_v7  ;;  %v6345_v10 = vpop.f32.mrb[69].mxu1 }
 0x3ca   : > { %v3761_v53 = vsel %vm1057_vm0, %v7858_v54, -inf }
 0x3cb   : > { %3762 = vmax.xlane.f32.xlu0 %v3761_v53 }
 0x3cf   : > { %v3431_v33 = vpop.f32.mrb[80].mxu0 }
 0x3d0   : > { %v7862_v0 = vmul.f32 0.088388346, %v3431_v33  ;;  %v6352_v60 = vpop.f32.mrb[81].mxu0 }
 0x3d2   : > { %v3764_v5 = vsel %vm1057_vm0, %v7862_v0, -inf }
 0x3d3   : > { %3765 = vmax.xlane.f32.xlu1 %v3764_v5 }
 0x3d7   : > { %v3501_v46 = vpop.f32.mrb[70].mxu1 }
 0x3d8   : > { %v7866_v21 = vmul.f32 0.088388346, %v3501_v46  ;;  %v6359_v42 = vpop.f32.mrb[71].mxu1 }
 0x3da   : > { %v3767_v18 = vsel %vm1057_vm0, %v7866_v21, -inf }
 0x3db   : > { %3768 = vmax.xlane.f32.xlu0 %v3767_v18 }
 0x3df   : > { %v3571_v48 = vpop.f32.mrb[82].mxu0 }
 0x3e0   : > { %v7870_v14 = vmul.f32 0.088388346, %v3571_v48  ;;  %v6366_v59 = vpop.f32.mrb[83].mxu0 }
 0x3e2   : > { %v3770_v24 = vsel %vm1057_vm0, %v7870_v14, -inf }
 0x3e3   : > { %3771 = vmax.xlane.f32.xlu1 %v3770_v24 }
 0x3e7   : > { %v3641_v62 = vpop.f32.mrb[72].mxu1 }
 0x3e8   : > { %v7874_v17 = vmul.f32 0.088388346, %v3641_v62  ;;  %v6373_v11 = vpop.f32.mrb[73].mxu1 }
 0x3ea   : > { %v3773_v61 = vsel %vm1057_vm0, %v7874_v17, -inf }
 0x3eb   : > { %3774 = vmax.xlane.f32.xlu0 %v3773_v61 }
 0x3ef   : > { %v3711_v43 = vpop.f32.mrb[84].mxu0 }
 0x3f0   : > { %v7878_v31 = vmul.f32 0.088388346, %v3711_v43  ;;  %v6380_v7 = vpop.f32.mrb[85].mxu0 }
 0x3f2   : > { %v3776_v10 = vsel %vm1057_vm0, %v7878_v31, -inf }
 0x3f3   : > { %3777 = vmax.xlane.f32.xlu1 %v3776_v10 }
 0x410   : > { %v3733_v53 = vpop.xlane.xlu0 %3732 }
 0x411   : > { %v3779_v33 = vsub.f32 %v7818_v30, %v3733_v53 }
 0x413   : > { %v3795_v60 = vmul.f32 1.442695, %v3779_v33 }
 0x415   : > { %6827 = vpow2.f32 %v3795_v60 }
 0x418   : > { %v3736_v5 = vpop.xlane.xlu1 %3735  ;;  %v3739_v46 = vpop.xlane.xlu0 %3738 }
 0x419   : > { %v3780_v42 = vsub.f32 %v7822_v8, %v3736_v5  ;;  %v3781_v18 = vsub.f32 %v7824_v34, %v3739_v46 }
 0x41b   : > { %v3797_v48 = vmul.f32 1.442695, %v3780_v42  ;;  %v3799_v59 = vmul.f32 1.442695, %v3781_v18 }
 0x41d   : > { %6829 = vpow2.f32 %v3797_v48 }
 0x41e   : > { %6831 = vpow2.f32 %v3799_v59 }
 0x41f   : > { %v7885_v24 = vpop.eup %6827 }
 0x420   : > { %v3742_v62 = vpop.xlane.xlu1 %3741  ;;  %v3827_v11 = vsel %vm1057_vm0, %v7885_v24, 0.0 }
 0x421   : > { %v3782_v30 = vsub.f32 %v7830_v58, %v3742_v62  ;;  %3828 = vadd.xlane.f32.xlu0 %v3827_v11 }
 0x423   : > { %v3801_v61 = vmul.f32 1.442695, %v3782_v30 }
 0x425   : > { %6833 = vpow2.f32 %v3801_v61 }
 0x427   : > { %v7890_v43 = vpop.eup %6829 }
 0x428   : > { %v3745_v8 = vpop.xlane.xlu0 %3744  ;;  %v7892_v7 = vpop.eup %6831  ;;  %v3830_v10 = vsel %vm1057_vm0, %v7890_v43, 0.0 }
 0x429   : > { %v3783_v34 = vsub.f32 %v7834_v13, %v3745_v8  ;;  %3831 = vadd.xlane.f32.xlu1 %v3830_v10  ;;  %v3833_v53 = vsel %vm1057_vm0, %v7892_v7, 0.0 }
 0x42a   : > { %3834 = vadd.xlane.f32.xlu0 %v3833_v53 }
 0x42b   : > { %v3803_v33 = vmul.f32 1.442695, %v3783_v34 }
 0x42d   : > { %6835 = vpow2.f32 %v3803_v33 }
 0x42f   : > { %v7899_v58 = vpop.eup %6833 }
 0x430   : > { %v3748_v60 = vpop.xlane.xlu1 %3747  ;;  %v3836_v46 = vsel %vm1057_vm0, %v7899_v58, 0.0 }
 0x431   : > { %v3784_v5 = vsub.f32 %v7838_v55, %v3748_v60  ;;  %3837 = vadd.xlane.f32.xlu1 %v3836_v46 }
 0x433   : > { %v3805_v13 = vmul.f32 1.442695, %v3784_v5 }
 0x435   : > { %6837 = vpow2.f32 %v3805_v13 }
 0x437   : > { %v7904_v42 = vpop.eup %6835 }
 0x438   : > { %v3751_v18 = vpop.xlane.xlu0 %3750  ;;  %v3839_v48 = vsel %vm1057_vm0, %v7904_v42, 0.0 }
 0x439   : > { %v3785_v59 = vsub.f32 %v7842_v56, %v3751_v18  ;;  %3840 = vadd.xlane.f32.xlu0 %v3839_v48 }
 0x43b   : > { %v3807_v62 = vmul.f32 1.442695, %v3785_v59 }
 0x43d   : > { %6839 = vpow2.f32 %v3807_v62 }
 0x43f   : > { %v7909_v11 = vpop.eup %6837 }
 0x440   : > { %v3754_v55 = vpop.xlane.xlu1 %3753  ;;  %v3842_v30 = vsel %vm1057_vm0, %v7909_v11, 0.0 }
 0x441   : > { %v3786_v61 = vsub.f32 %v7846_v28, %v3754_v55  ;;  %3843 = vadd.xlane.f32.xlu1 %v3842_v30 }
 0x443   : > { %v3809_v8 = vmul.f32 1.442695, %v3786_v61 }
 0x445   : > { %6841 = vpow2.f32 %v3809_v8 }
 0x447   : > { %v7914_v34 = vpop.eup %6839 }
 0x448   : > { %v3757_v10 = vpop.xlane.xlu0 %3756  ;;  %v3845_v56 = vsel %vm1057_vm0, %v7914_v34, 0.0 }
 0x449   : > { %v3787_v53 = vsub.f32 %v7850_v15, %v3757_v10  ;;  %3846 = vadd.xlane.f32.xlu0 %v3845_v56 }
 0x44b   : > { %v3811_v33 = vmul.f32 1.442695, %v3787_v53 }
 0x44d   : > { %6843 = vpow2.f32 %v3811_v33 }
 0x44f   : > { %v7919_v60 = vpop.eup %6841 }
 0x450   : > { %v3760_v5 = vpop.xlane.xlu1 %3759  ;;  %v3848_v28 = vsel %vm1057_vm0, %v7919_v60, 0.0 }
 0x451   : > { %v3788_v46 = vsub.f32 %v7854_v32, %v3760_v5  ;;  %3849 = vadd.xlane.f32.xlu1 %v3848_v28 }
 0x453   : > { %v3813_v13 = vmul.f32 1.442695, %v3788_v46 }
 0x455   : > { %6845 = vpow2.f32 %v3813_v13 }
 0x457   : > { %v7924_v18 = vpop.eup %6843 }
 0x458   : > { %v3763_v48 = vpop.xlane.xlu0 %3762  ;;  %v3851_v15 = vsel %vm1057_vm0, %v7924_v18, 0.0 }
 0x459   : > { %v3789_v59 = vsub.f32 %v7858_v54, %v3763_v48  ;;  %3852 = vadd.xlane.f32.xlu0 %v3851_v15 }
 0x45b   : > { %v3815_v62 = vmul.f32 1.442695, %v3789_v59 }
 0x45d   : > { %6847 = vpow2.f32 %v3815_v62 }
 0x45f   : > { %v7929_v55 = vpop.eup %6845 }
 0x460   : > { %v3766_v30 = vpop.xlane.xlu1 %3765  ;;  %v3854_v32 = vsel %vm1057_vm0, %v7929_v55, 0.0 }
 0x461   : > { %v3790_v61 = vsub.f32 %v7862_v0, %v3766_v30  ;;  %3855 = vadd.xlane.f32.xlu1 %v3854_v32 }
 0x463   : > { %v3817_v8 = vmul.f32 1.442695, %v3790_v61 }
 0x465   : > { %6849 = vpow2.f32 %v3817_v8 }
 0x467   : > { %v7934_v10 = vpop.eup %6847 }
 0x468   : > { %v3769_v56 = vpop.xlane.xlu0 %3768  ;;  %v3857_v54 = vsel %vm1057_vm0, %v7934_v10, 0.0 }
 0x469   : > { %v3791_v53 = vsub.f32 %v7866_v21, %v3769_v56  ;;  %3858 = vadd.xlane.f32.xlu0 %v3857_v54 }
 0x46b   : > { %v3819_v33 = vmul.f32 1.442695, %v3791_v53 }
 0x46d   : > { %6851 = vpow2.f32 %v3819_v33 }
 0x46f   : > { %v7939_v5 = vpop.eup %6849 }
 0x470   : > { %v3772_v28 = vpop.xlane.xlu1 %3771  ;;  %v3860_v0 = vsel %vm1057_vm0, %v7939_v5, 0.0 }
 0x471   : > { %v3792_v46 = vsub.f32 %v7870_v14, %v3772_v28  ;;  %3861 = vadd.xlane.f32.xlu1 %v3860_v0 }
 0x473   : > { %v3821_v13 = vmul.f32 1.442695, %v3792_v46 }
 0x475   : > { %6853 = vpow2.f32 %v3821_v13  ;;  %v8321_v13 = vpack.c.bf16 %v7458_v44, %v7455_v63  ;;  %v8322_v63 = vpack.c.bf16 %v7475_v22, %v7472_v4 }
 0x477   : > { %v7944_v48 = vpop.eup %6851 }
 0x478   : > { %v3775_v15 = vpop.xlane.xlu0 %3774  ;;  %v3863_v21 = vsel %vm1057_vm0, %v7944_v48, 0.0 }
 0x479   : > { %v3793_v59 = vsub.f32 %v7874_v17, %v3775_v15  ;;  %3864 = vadd.xlane.f32.xlu0 %v3863_v21 }
 0x47b   : > { %v3823_v62 = vmul.f32 1.442695, %v3793_v59 }
 0x47d   : > { %6855 = vpow2.f32 %v3823_v62 }
 0x47f   : > { %v7949_v30 = vpop.eup %6853 }
 0x480   : > { %v3778_v32 = vpop.xlane.xlu1 %3777  ;;  %v3866_v14 = vsel %vm1057_vm0, %v7949_v30, 0.0 }
 0x481   : > { %v3794_v61 = vsub.f32 %v7878_v31, %v3778_v32  ;;  %3867 = vadd.xlane.f32.xlu1 %v3866_v14  ;;  %v8323_v32 = vpack.c.bf16 %v7497_v2, %v7494_v29  ;;  %v8324_v29 = vpack.c.bf16 %v7522_v19, %v7519_v36 }
 0x483   : > { %v3825_v8 = vmul.f32 1.442695, %v3794_v61 }
 0x485   : > { %6857 = vpow2.f32 %v3825_v8 }
 0x487   : > { %v7954_v56 = vpop.eup %6855 }
 0x488   : > { %v3869_v17 = vsel %vm1057_vm0, %v7954_v56, 0.0 }
 0x489   : > { %3870 = vadd.xlane.f32.xlu0 %v3869_v17 }
 0x48f   : > { %v7958_v54 = vpop.eup %6857 }
 0x490   : > { %v3872_v53 = vsel %vm1057_vm0, %v7958_v54, 0.0 }
 0x491   : > { %3873 = vadd.xlane.f32.xlu1 %v3872_v53 }
 0x4ae   : > { %v3829_v33 = vpop.xlane.xlu0 %3828 }
 0x4af   : > { %6859 = vrcp.f32 %v3829_v33 }
 0x4b6   : > { %v3832_v28 = vpop.xlane.xlu1 %3831 }
 0x4b7   : > { %6861 = vrcp.f32 %v3832_v28  ;;  %v3835_v31 = vpop.xlane.xlu0 %3834 }
 0x4b8   : > { %6863 = vrcp.f32 %v3835_v31 }
 0x4b9   : > { %v6860_v0 = vpop.eup %6859 }
 0x4ba   : > { %v3876_v46 = vmul.f32 %v6860_v0, %v7885_v24 }
 0x4bc   : > { %5560 = vst.msk [vmem:[%s7966_s15] sm:$0xf] %vm1057_vm0, %v3876_v46  ;;  %6386 = vmatmul.mubr.msk.f32.vlgmr.msra.gmra.mrb[74].mxu1 %vm1426_vm8, %v3876_v46  ;;  %v5914_v46 = vld [vmem:[%s8314_s4 + $0x20] sm:$0xff] }
 0x4bd   : > { %6641 = vmatpush3.bf16.msra.mxu1 %v8321_v13  ;;  %6399 = vmatprep.mubr.msk.f32.mxu1 %vm6901_vm6, %v6902_v37  ;;  %v5915_v13 = vld [vmem:[%s8314_s4 + $0x28] sm:$0xff] }
 0x4be   : > { %v3838_v15 = vpop.xlane.xlu1 %3837  ;;  %6645 = vmatprep.subr.bf16.mxu1 %v6900_v52 }
 0x4bf   : > { %6865 = vrcp.f32 %v3838_v15  ;;  %v8132_v15 = vpack.c.bf16 %v5915_v13, %v5914_v46 }
 0x4c1   : > { %v6862_v21 = vpop.eup %6861 }
 0x4c2   : > { %v6864_v59 = vpop.eup %6863  ;;  %v3878_v62 = vmul.f32 %v6862_v21, %v7890_v43 }
 0x4c3   : > { %v3880_v24 = vmul.f32 %v6864_v59, %v7892_v7 }
 0x4c4   : > { %5561 = vst.msk [vmem:[%s7966_s15 + $0x18] sm:$0xf] %vm1057_vm0, %v3878_v62  ;;  %6393 = vmatmul.mubr.msk.f32.vlgmr.msra.gmra.mrb[86].mxu0 %vm1426_vm8, %v3878_v62 }
 0x4c5   : > { %5562 = vst.msk [vmem:[%s7966_s15 + $0x30] sm:$0xf] %vm1057_vm0, %v3880_v24  ;;  %6644 = vmatpush3.bf16.msra.mxu0 %v8322_v63  ;;  %6400 = vmatmul.mubr.msk.f32.vlgmr.msra.gmra.mrb[76].mxu1 %vm1426_vm8, %v3880_v24 }
 0x4c6   : > { %v3841_v44 = vpop.xlane.xlu0 %3840  ;;  %6647 = vmatpush3.bf16.msra.mxu1 %v8323_v32  ;;  %6406 = vmatprep.mubr.msk.f32.mxu0 %vm6901_vm6, %v6902_v37 }
 0x4c7   : > { %6867 = vrcp.f32 %v3841_v44  ;;  %6648 = vmatprep.subr.bf16.mxu0 %v6900_v52  ;;  %6413 = vmatprep.mubr.msk.f32.mxu1 %vm6901_vm6, %v6902_v37 }
 0x4c8   : > { %6651 = vmatprep.subr.bf16.mxu1 %v6900_v52 }
 0x4c9   : > { %v6866_v4 = vpop.eup %6865 }
 0x4ca   : > { %v3882_v22 = vmul.f32 %v6866_v4, %v7899_v58  ;;  %v8325_v58 = vpack.c.bf16 %v7542_v41, %v7539_v20 }
 0x4cc   : > { %5563 = vst.msk [vmem:[%s7966_s15 + $0x48] sm:$0xf] %vm1057_vm0, %v3882_v22  ;;  %6407 = vmatmul.mubr.msk.f32.vlgmr.msra.gmra.mrb[88].mxu0 %vm1426_vm8, %v3882_v22 }
 0x4cd   : > { %6650 = vmatpush3.bf16.msra.mxu0 %v8324_v29  ;;  %6420 = vmatprep.mubr.msk.f32.mxu0 %vm6901_vm6, %v6902_v37 }
 0x4ce   : > { %v3844_v2 = vpop.xlane.xlu1 %3843  ;;  %6654 = vmatprep.subr.bf16.mxu0 %v6900_v52 }
 0x4cf   : > { %6869 = vrcp.f32 %v3844_v2 }
 0x4d1   : > { %v6868_v43 = vpop.eup %6867 }
 0x4d2   : > { %v3884_v7 = vmul.f32 %v6868_v43, %v7904_v42  ;;  %v8326_v42 = vpack.c.bf16 %v7562_v6, %v7559_v27 }
 0x4d4   : > { %5564 = vst.msk [vmem:[%s7966_s15 + $0x60] sm:$0xf] %vm1057_vm0, %v3884_v7  ;;  %6414 = vmatmul.mubr.msk.f32.vlgmr.msra.gmra.mrb[78].mxu1 %vm1426_vm8, %v3884_v7 }
 0x4d5   : > { %6653 = vmatpush3.bf16.msra.mxu1 %v8325_v58  ;;  %6427 = vmatprep.mubr.msk.f32.mxu1 %vm6901_vm6, %v6902_v37 }
 0x4d6   : > { %v3847_v36 = vpop.xlane.xlu0 %3846  ;;  %6657 = vmatprep.subr.bf16.mxu1 %v6900_v52 }
 0x4d7   : > { %6871 = vrcp.f32 %v3847_v36 }
 0x4d9   : > { %v6870_v19 = vpop.eup %6869 }
 0x4da   : > { %v3886_v14 = vmul.f32 %v6870_v19, %v7909_v11  ;;  %v8327_v11 = vpack.c.bf16 %v7582_v45, %v7579_v39 }
 0x4dc   : > { %5565 = vst.msk [vmem:[%s7966_s15 + $0x78] sm:$0xf] %vm1057_vm0, %v3886_v14  ;;  %6421 = vmatmul.mubr.msk.f32.vlgmr.msra.gmra.mrb[90].mxu0 %vm1426_vm8, %v3886_v14 }
 0x4dd   : > { %6656 = vmatpush3.bf16.msra.mxu0 %v8326_v42  ;;  %6434 = vmatprep.mubr.msk.f32.mxu0 %vm6901_vm6, %v6902_v37 }
 0x4de   : > { %v3850_v20 = vpop.xlane.xlu1 %3849  ;;  %6660 = vmatprep.subr.bf16.mxu0 %v6900_v52 }
 0x4df   : > { %6873 = vrcp.f32 %v3850_v20 }
 0x4e1   : > { %v6872_v41 = vpop.eup %6871 }
 0x4e2   : > { %v3888_v61 = vmul.f32 %v6872_v41, %v7914_v34  ;;  %v8328_v34 = vpack.c.bf16 %v7602_v1, %v7599_v23 }
 0x4e4   : > { %5566 = vst.msk [vmem:[%s7966_s15 + $0x90] sm:$0xf] %vm1057_vm0, %v3888_v61  ;;  %6428 = vmatmul.mubr.msk.f32.vlgmr.msra.gmra.mrb[80].mxu1 %vm1426_vm8, %v3888_v61 }
 0x4e5   : > { %6659 = vmatpush3.bf16.msra.mxu1 %v8327_v11  ;;  %6441 = vmatprep.mubr.msk.f32.mxu1 %vm6901_vm6, %v6902_v37 }
 0x4e6   : > { %v3853_v27 = vpop.xlane.xlu0 %3852  ;;  %6663 = vmatprep.subr.bf16.mxu1 %v6900_v52 }
 0x4e7   : > { %6875 = vrcp.f32 %v3853_v27 }
 0x4e9   : > { %v6874_v6 = vpop.eup %6873 }
 0x4ea   : > { %v3890_v8 = vmul.f32 %v6874_v6, %v7919_v60  ;;  %v8329_v60 = vpack.c.bf16 %v7622_v12, %v7619_v51 }
 0x4ec   : > { %5567 = vst.msk [vmem:[%s7966_s15 + $0xa8] sm:$0xf] %vm1057_vm0, %v3890_v8  ;;  %6435 = vmatmul.mubr.msk.f32.vlgmr.msra.gmra.mrb[92].mxu0 %vm1426_vm8, %v3890_v8 }
 0x4ed   : > { %6662 = vmatpush3.bf16.msra.mxu0 %v8328_v34  ;;  %6448 = vmatprep.mubr.msk.f32.mxu0 %vm6901_vm6, %v6902_v37 }
 0x4ee   : > { %v3856_v39 = vpop.xlane.xlu1 %3855  ;;  %6666 = vmatprep.subr.bf16.mxu0 %v6900_v52 }
 0x4ef   : > { %6877 = vrcp.f32 %v3856_v39 }
 0x4f1   : > { %v6876_v45 = vpop.eup %6875 }
 0x4f2   : > { %v3892_v17 = vmul.f32 %v6876_v45, %v7924_v18  ;;  %v8330_v18 = vpack.c.bf16 %v7642_v50, %v7639_v47 }
 0x4f4   : > { %5568 = vst.msk [vmem:[%s7966_s15 + $0xc0] sm:$0xf] %vm1057_vm0, %v3892_v17  ;;  %6442 = vmatmul.mubr.msk.f32.vlgmr.msra.gmra.mrb[82].mxu1 %vm1426_vm8, %v3892_v17 }
 0x4f5   : > { %6665 = vmatpush3.bf16.msra.mxu1 %v8329_v60  ;;  %6455 = vmatprep.mubr.msk.f32.mxu1 %vm6901_vm6, %v6902_v37 }
 0x4f6   : > { %v3859_v23 = vpop.xlane.xlu0 %3858  ;;  %6669 = vmatprep.subr.bf16.mxu1 %v6900_v52 }
 0x4f7   : > { %6879 = vrcp.f32 %v3859_v23 }
 0x4f9   : > { %v6878_v1 = vpop.eup %6877 }
 0x4fa   : > { %v3894_v53 = vmul.f32 %v6878_v1, %v7929_v55  ;;  %v8331_v55 = vpack.c.bf16 %v7662_v57, %v7659_v9 }
 0x4fc   : > { %5569 = vst.msk [vmem:[%s7966_s15 + $0xd8] sm:$0xf] %vm1057_vm0, %v3894_v53  ;;  %6449 = vmatmul.mubr.msk.f32.vlgmr.msra.gmra.mrb[94].mxu0 %vm1426_vm8, %v3894_v53 }
 0x4fd   : > { %6668 = vmatpush3.bf16.msra.mxu0 %v8330_v18  ;;  %6462 = vmatprep.mubr.msk.f32.mxu0 %vm6901_vm6, %v6902_v37 }
 0x4fe   : > { %v3862_v51 = vpop.xlane.xlu1 %3861  ;;  %6672 = vmatprep.subr.bf16.mxu0 %v6900_v52 }
 0x4ff   : > { %6881 = vrcp.f32 %v3862_v51 }
 0x501   : > { %v6880_v12 = vpop.eup %6879 }
 0x502   : > { %v3896_v33 = vmul.f32 %v6880_v12, %v7934_v10  ;;  %v8332_v10 = vpack.c.bf16 %v7682_v40, %v7679_v35  ;;  %v8333_v35 = vpack.c.bf16 %v7702_v16, %v7699_v38 }
 0x504   : > { %5570 = vst.msk [vmem:[%s7966_s15 + $0xf0] sm:$0xf] %vm1057_vm0, %v3896_v33  ;;  %6456 = vmatmul.mubr.msk.f32.vlgmr.msra.gmra.mrb[84].mxu1 %vm1426_vm8, %v3896_v33 }
 0x505   : > { %6671 = vmatpush3.bf16.msra.mxu1 %v8331_v55  ;;  %6469 = vmatprep.mubr.msk.f32.mxu1 %vm6901_vm6, %v6902_v37 }
 0x506   : > { %v3865_v47 = vpop.xlane.xlu0 %3864  ;;  %6675 = vmatprep.subr.bf16.mxu1 %v6900_v52 }
 0x507   : > { %6883 = vrcp.f32 %v3865_v47 }
 0x509   : > { %v6882_v50 = vpop.eup %6881 }
 0x50a   : > { %v3898_v28 = vmul.f32 %v6882_v50, %v7939_v5 }
 0x50c   : > { %5571 = vst.msk [vmem:[%s7966_s15 + $0x108] sm:$0xf] %vm1057_vm0, %v3898_v28  ;;  %6463 = vmatmul.mubr.msk.f32.vlgmr.msra.gmra.mrb[96].mxu0 %vm1426_vm8, %v3898_v28 }
 0x50d   : > { %6674 = vmatpush3.bf16.msra.mxu0 %v8332_v10  ;;  %6476 = vmatprep.mubr.msk.f32.mxu0 %vm6901_vm6, %v6902_v37 }
 0x50e   : > { %v3868_v9 = vpop.xlane.xlu1 %3867  ;;  %6678 = vmatprep.subr.bf16.mxu0 %v6900_v52 }
 0x50f   : > { %6885 = vrcp.f32 %v3868_v9 }
 0x511   : > { %v6884_v57 = vpop.eup %6883 }
 0x512   : > { %v3900_v31 = vmul.f32 %v6884_v57, %v7944_v48 }
 0x514   : > { %5572 = vst.msk [vmem:[%s7966_s15 + $0x120] sm:$0xf] %vm1057_vm0, %v3900_v31  ;;  %6470 = vmatmul.mubr.msk.f32.vlgmr.msra.gmra.mrb[86].mxu1 %vm1426_vm8, %v3900_v31 }
 0x515   : > { %6677 = vmatpush3.bf16.msra.mxu1 %v8333_v35  ;;  %6483 = vmatprep.mubr.msk.f32.mxu1 %vm6901_vm6, %v6902_v37 }
 0x516   : > { %v3871_v40 = vpop.xlane.xlu0 %3870 }
 0x517   : > { %6887 = vrcp.f32 %v3871_v40 }
 0x519   : > { %v6886_v52 = vpop.eup %6885 }
 0x51a   : > { %v3902_v5 = vmul.f32 %v6886_v52, %v7949_v30 }
 0x51c   : > { %5573 = vst.msk [vmem:[%s7966_s15 + $0x138] sm:$0xf] %vm1057_vm0, %v3902_v5  ;;  %6477 = vmatmul.mubr.msk.f32.vlgmr.msra.gmra.mrb[98].mxu0 %vm1426_vm8, %v3902_v5 }
 0x51d   : > { %6680 = vmatpush3.bf16.msra.mxu0 %v6679_v3  ;;  %6490 = vmatprep.mubr.msk.f32.mxu0 %vm6901_vm6, %v6902_v37  ;;  %v5076_v37 = vld [vmem:[%s8314_s4] sm:$0xff]  ;;  %v5078_v3 = vld [vmem:[%s8314_s4 + $0x10] sm:$0xff]  ;;  %vm5097_vm6 = vcmask 1041409  }
 0x51e   : > { %v3874_v38 = vpop.xlane.xlu1 %3873  ;;  %v6681_v26 = vpack.c.bf16 %v5077_v49, %v5076_v37 }
 0x51f   : > { %6889 = vrcp.f32 %v3874_v38 }
 0x520   : > { %6682 = vmatprep.subr.bf16.mxu1 %v6681_v26 }
 0x521   : > { %v6888_v16 = vpop.eup %6887 }
 0x522   : > { %v3904_v48 = vmul.f32 %v6888_v16, %v7954_v56  ;;  %v5079_v56 = vld [vmem:[%s8314_s4 + $0x18] sm:$0xff] }
 0x524   : > { %5574 = vst.msk [vmem:[%s7966_s15 + $0x150] sm:$0xf] %vm1057_vm0, %v3904_v48  ;;  %6484 = vmatmul.mubr.msk.f32.vlgmr.msra.gmra.mrb[88].mxu1 %vm1426_vm8, %v3904_v48 }
 0x525   : > { %6684 = vmatpush3.bf16.msra.mxu1 %v6681_v26 }
 0x529   : > { %v6890_v30 = vpop.eup %6889 }
 0x52a   : > { %v3906_v0 = vmul.f32 %v6890_v30, %v7958_v54  ;;  %v6685_v54 = vpack.c.bf16 %v5079_v56, %v5078_v3 }
 0x52c   : > { %5575 = vst.msk [vmem:[%s7966_s15 + $0x168] sm:$0xf] %vm1057_vm0, %v3906_v0  ;;  %6491 = vmatmul.mubr.msk.f32.vlgmr.msra.gmra.mrb[100].mxu0 %vm1426_vm8, %v3906_v0  ;;  %6686 = vmatprep.subr.bf16.mxu1 %v6685_v54  ;;  %vm5576_vm0 = vcmask 257024   ;;  %vm5100_vm8 = vcmask 1042434  }
 0x52d   : > { %6688 = vmatpush3.bf16.msra.mxu1 %v6685_v54 }
 0x52e   : > { %6690 = vmatprep.subr.bf16.mxu1 %v8132_v15 }
 0x58f   : > { %v3976_v21 = vpop.f32.mrb[74].mxu1 }
 0x590   : > { %5577 = vst.msk [vmem:[%s7966_s15 + $0x8] sm:$0xf] %vm5576_vm0, %v3976_v21  ;;  %v6387_v59 = vpop.f32.mrb[75].mxu1  ;;  %v5223_v62 = vrot.slane %v3976_v21, 1  ;;  %v5337_v24 = vrot.slane %v3976_v21, 2  ;;  %v5451_v63 = vrot.slane %v3976_v21, 3 }
 0x597   : > { %v4049_v44 = vpop.f32.mrb[86].mxu0 }
 0x598   : > { %v5096_v32 = vrot.slane %v4049_v44, 7  ;;  %v5224_v4 = vsel %vm5097_vm6, %v4049_v44, %v5223_v62  ;;  %v5338_v22 = vrot.slane %v4049_v44, 1  ;;  %v5452_v29 = vrot.slane %v4049_v44, 2  ;;  %5578 = vst.msk [vmem:[%s7966_s15 + $0x20] sm:$0xf] %vm5576_vm0, %v4049_v44  ;;  %v6394_v2 = vpop.f32.mrb[87].mxu0 }
 0x599   : > { %v4122_v43 = vpop.f32.mrb[76].mxu1 }
 0x59a   : > { %v5099_v7 = vrot.slane %v4122_v43, 6  ;;  %v5225_v58 = vrot.slane %v4122_v43, 7  ;;  %v5454_v36 = vrot.slane %v4122_v43, 1  ;;  %5579 = vst.msk [vmem:[%s7966_s15 + $0x38] sm:$0xf] %vm5576_vm0, %v4122_v43  ;;  %v6401_v19 = vpop.f32.mrb[77].mxu1  ;;  %v5098_v14 = vsel %vm5097_vm6, %v5096_v32, %v3976_v21 }
 0x59b   : > { %v5339_v42 = vsel %vm5097_vm6, %v5338_v22, %v5337_v24  ;;  %v5453_v20 = vsel %vm5097_vm6, %v5452_v29, %v5451_v63 }
 0x59c   : > { %v5101_v41 = vsel %vm5100_vm8, %v5099_v7, %v5098_v14  ;;  %v5226_v61 = vsel %vm5100_vm8, %v5225_v58, %v5224_v4  ;;  %v5340_v11 = vsel %vm5100_vm8, %v4122_v43, %v5339_v42  ;;  %v5455_v27 = vsel %vm5100_vm8, %v5454_v36, %v5453_v20 }
 0x59f   : > { %v4195_v6 = vpop.f32.mrb[88].mxu0 }
 0x5a0   : > { %v5102_v8 = vrot.slane %v4195_v6, 5  ;;  %v5227_v34 = vrot.slane %v4195_v6, 6  ;;  %v5341_v39 = vrot.slane %v4195_v6, 7  ;;  %v5456_v45 = vsel %vm5103_vm12, %v4195_v6, %v5455_v27  ;;  %5580 = vst.msk [vmem:[%s7966_s15 + $0x50] sm:$0xf] %vm5576_vm0, %v4195_v6  ;;  %v6408_v17 = vpop.f32.mrb[89].mxu0 }
 0x5a2   : > { %v5104_v60 = vsel %vm5103_vm12, %v5102_v8, %v5101_v41  ;;  %v5228_v23 = vsel %vm5103_vm12, %v5227_v34, %v5226_v61  ;;  %v5342_v1 = vsel %vm5103_vm12, %v5341_v39, %v5340_v11 }
 0x5a7   : > { %v4268_v53 = vpop.f32.mrb[78].mxu1 }
 0x5a8   : > { %v5105_v18 = vrot.slane %v4268_v53, 4  ;;  %v5229_v51 = vrot.slane %v4268_v53, 5  ;;  %v5343_v12 = vrot.slane %v4268_v53, 6  ;;  %v5457_v33 = vrot.slane %v4268_v53, 7  ;;  %5581 = vst.msk [vmem:[%s7966_s15 + $0x68] sm:$0xf] %vm5576_vm0, %v4268_v53 }
 0x5a9   : > { %v6415_v55 = vpop.f32.mrb[79].mxu1 }
 0x5aa   : > { %v5107_v47 = vsel %vm5106_vm13, %v5105_v18, %v5104_v60  ;;  %v5230_v50 = vsel %vm5106_vm13, %v5229_v51, %v5228_v23  ;;  %v5344_v28 = vsel %vm5106_vm13, %v5343_v12, %v5342_v1  ;;  %v5458_v10 = vsel %vm5106_vm13, %v5457_v33, %v5456_v45 }
 0x5af   : > { %v4341_v9 = vpop.f32.mrb[90].mxu0 }
 0x5b0   : > { %v5108_v57 = vrot.slane %v4341_v9, 3  ;;  %v5231_v31 = vrot.slane %v4341_v9, 4  ;;  %v5345_v35 = vrot.slane %v4341_v9, 5  ;;  %v5459_v40 = vrot.slane %v4341_v9, 6  ;;  %5582 = vst.msk [vmem:[%s7966_s15 + $0x80] sm:$0xf] %vm5576_vm0, %v4341_v9 }
 0x5b1   : > { %v6422_v52 = vpop.f32.mrb[91].mxu0 }
 0x5b2   : > { %v5110_v5 = vsel %vm5109_vm14, %v5108_v57, %v5107_v47  ;;  %v5232_v38 = vsel %vm5109_vm14, %v5231_v31, %v5230_v50  ;;  %v5346_v16 = vsel %vm5109_vm14, %v5345_v35, %v5344_v28  ;;  %v5460_v48 = vsel %vm5109_vm14, %v5459_v40, %v5458_v10 }
 0x5b7   : > { %v4414_v30 = vpop.f32.mrb[80].mxu1 }
 0x5b8   : > { %v5111_v0 = vrot.slane %v4414_v30, 2  ;;  %v5233_v37 = vrot.slane %v4414_v30, 3  ;;  %v5347_v49 = vrot.slane %v4414_v30, 4  ;;  %v5461_v26 = vrot.slane %v4414_v30, 5  ;;  %5583 = vst.msk [vmem:[%s7966_s15 + $0x98] sm:$0xf] %vm5576_vm0, %v4414_v30 }
 0x5b9   : > { %v6429_v3 = vpop.f32.mrb[81].mxu1 }
 0x5ba   : > { %v5113_v56 = vsel %vm5112_vm15, %v5111_v0, %v5110_v5  ;;  %v5234_v54 = vsel %vm5112_vm15, %v5233_v37, %v5232_v38  ;;  %v5348_v46 = vsel %vm5112_vm15, %v5347_v49, %v5346_v16  ;;  %v5462_v13 = vsel %vm5112_vm15, %v5461_v26, %v5460_v48 }
 0x5bf   : > { %v4487_v21 = vpop.f32.mrb[92].mxu0 }
 0x5c0   : > { %5584 = vst.msk [vmem:[%s7966_s15 + $0xb0] sm:$0xf] %vm5576_vm0, %v4487_v21  ;;  %v6436_v59 = vpop.f32.mrb[93].mxu0  ;;  %v5114_v62 = vrot.slane %v4487_v21, 1  ;;  %v5235_v24 = vrot.slane %v4487_v21, 2  ;;  %v5349_v63 = vrot.slane %v4487_v21, 3 }
 0x5c1   : > { %v5463_v44 = vrot.slane %v4487_v21, 4 }
 0x5c2   : > { %v5116_v32 = vsel %vm5115_vm2, %v5114_v62, %v5113_v56  ;;  %v8177_v4 = vsel %vm5115_vm2, %v5235_v24, %v5234_v54  ;;  %v8180_v22 = vsel %vm5115_vm2, %v5349_v63, %v5348_v46 }
 0x5c3   : > { %v8183_v29 = vsel %vm5115_vm2, %v5463_v44, %v5462_v13  ;;  %6501 = vmatprep.mubr.msk.f32.mxu1 %vm472_vm1, %v5116_v32 }
 0x5c7   : > { %v4560_v2 = vpop.f32.mrb[82].mxu1 }
 0x5c8   : > { %5585 = vst.msk [vmem:[%s7966_s15 + $0xc8] sm:$0xf] %vm5576_vm0, %v4560_v2  ;;  %v6443_v43 = vpop.f32.mrb[83].mxu1  ;;  %v5237_v7 = vrot.slane %v4560_v2, 1  ;;  %v5351_v58 = vrot.slane %v4560_v2, 2  ;;  %v5465_v36 = vrot.slane %v4560_v2, 3 }
 0x5cf   : > { %v4633_v19 = vpop.f32.mrb[94].mxu0 }
 0x5d0   : > { %v5117_v14 = vrot.slane %v4633_v19, 7  ;;  %v5238_v42 = vsel %vm5097_vm6, %v4633_v19, %v5237_v7  ;;  %v5352_v20 = vrot.slane %v4633_v19, 1  ;;  %v5466_v41 = vrot.slane %v4633_v19, 2  ;;  %5586 = vst.msk [vmem:[%s7966_s15 + $0xe0] sm:$0xf] %vm5576_vm0, %v4633_v19  ;;  %v6450_v61 = vpop.f32.mrb[95].mxu0 }
 0x5d2   : > { %v5118_v11 = vsel %vm5097_vm6, %v5117_v14, %v4560_v2  ;;  %v5353_v27 = vsel %vm5097_vm6, %v5352_v20, %v5351_v58  ;;  %v5467_v6 = vsel %vm5097_vm6, %v5466_v41, %v5465_v36  ;;  %v5916_v58 = vld [vmem:[%s8314_s4 + $0x30] sm:$0xff]  ;;  %v5917_v36 = vld [vmem:[%s8314_s4 + $0x38] sm:$0xff] }
 0x5d7   : > { %v4706_v8 = vpop.f32.mrb[84].mxu1 }
 0x5d8   : > { %v5119_v34 = vrot.slane %v4706_v8, 6  ;;  %v5239_v39 = vrot.slane %v4706_v8, 7  ;;  %v5354_v45 = vsel %vm5100_vm8, %v4706_v8, %v5353_v27  ;;  %v5468_v17 = vrot.slane %v4706_v8, 1  ;;  %5587 = vst.msk [vmem:[%s7966_s15 + $0xf8] sm:$0xf] %vm5576_vm0, %v4706_v8  ;;  %v6457_v60 = vpop.f32.mrb[85].mxu1 }
 0x5d9   : > { %v5920_v8 = vld [vmem:[%s8314_s4 + $0x40] sm:$0xff]  ;;  %v5922_v60 = vld [vmem:[%s8314_s4 + $0x50] sm:$0xff] }
 0x5da   : > { %v5120_v23 = vsel %vm5100_vm8, %v5119_v34, %v5118_v11  ;;  %v5240_v1 = vsel %vm5100_vm8, %v5239_v39, %v5238_v42  ;;  %v5469_v53 = vsel %vm5100_vm8, %v5468_v17, %v5467_v6  ;;  %v6693_v11 = vpack.c.bf16 %v5917_v36, %v5916_v58  ;;  %v5921_v34 = vld [vmem:[%s8314_s4 + $0x48] sm:$0xff] }
 0x5db   : > { %v6697_v17 = vpack.c.bf16 %v5921_v34, %v5920_v8 }
 0x5df   : > { %v4779_v18 = vpop.f32.mrb[96].mxu0 }
 0x5e0   : > { %v5121_v51 = vrot.slane %v4779_v18, 5  ;;  %v5241_v12 = vrot.slane %v4779_v18, 6  ;;  %v5355_v33 = vrot.slane %v4779_v18, 7  ;;  %v5470_v55 = vsel %vm5103_vm12, %v4779_v18, %v5469_v53  ;;  %5588 = vst.msk [vmem:[%s7966_s15 + $0x110] sm:$0xf] %vm5576_vm0, %v4779_v18  ;;  %v6464_v47 = vpop.f32.mrb[97].mxu0 }
 0x5e1   : > { %v5928_v18 = vld [vmem:[%s8314_s4 + $0x70] sm:$0xff]  ;;  %v5913_v47 = vld [vmem:[%s8317_s7] ss:$0 sm:$0xff] }
 0x5e2   : > { %v5122_v50 = vsel %vm5103_vm12, %v5121_v51, %v5120_v23  ;;  %v5242_v28 = vsel %vm5103_vm12, %v5241_v12, %v5240_v1  ;;  %v5356_v10 = vsel %vm5103_vm12, %v5355_v33, %v5354_v45  ;;  %v5923_v23 = vld [vmem:[%s8314_s4 + $0x58] sm:$0xff] }
 0x5e3   : > { %v6701_v1 = vpack.c.bf16 %v5923_v23, %v5922_v60  ;;  %v5929_v51 = vld [vmem:[%s8314_s4 + $0x78] sm:$0xff] }
 0x5e4   : > { %v6709_v12 = vpack.c.bf16 %v5929_v51, %v5928_v18 }
 0x5e7   : > { %v4852_v9 = vpop.f32.mrb[86].mxu1 }
 0x5e8   : > { %v5123_v57 = vrot.slane %v4852_v9, 4  ;;  %v5243_v31 = vrot.slane %v4852_v9, 5  ;;  %v5357_v35 = vrot.slane %v4852_v9, 6  ;;  %v5471_v40 = vrot.slane %v4852_v9, 7  ;;  %5589 = vst.msk [vmem:[%s7966_s15 + $0x128] sm:$0xf] %vm5576_vm0, %v4852_v9 }
 0x5e9   : > { %v6471_v52 = vpop.f32.mrb[87].mxu1 }
 0x5ea   : > { %v5124_v5 = vsel %vm5106_vm13, %v5123_v57, %v5122_v50  ;;  %v5244_v38 = vsel %vm5106_vm13, %v5243_v31, %v5242_v28  ;;  %v5358_v16 = vsel %vm5106_vm13, %v5357_v35, %v5356_v10  ;;  %v5472_v48 = vsel %vm5106_vm13, %v5471_v40, %v5470_v55 }
 0x5ef   : > { %v4925_v30 = vpop.f32.mrb[98].mxu0 }
 0x5f0   : > { %v5125_v0 = vrot.slane %v4925_v30, 3  ;;  %v5245_v37 = vrot.slane %v4925_v30, 4  ;;  %v5359_v49 = vrot.slane %v4925_v30, 5  ;;  %v5473_v26 = vrot.slane %v4925_v30, 6  ;;  %5590 = vst.msk [vmem:[%s7966_s15 + $0x140] sm:$0xf] %vm5576_vm0, %v4925_v30 }
 0x5f1   : > { %v6478_v3 = vpop.f32.mrb[99].mxu0 }
 0x5f2   : > { %v5126_v56 = vsel %vm5109_vm14, %v5125_v0, %v5124_v5  ;;  %v5246_v54 = vsel %vm5109_vm14, %v5245_v37, %v5244_v38  ;;  %v5360_v46 = vsel %vm5109_vm14, %v5359_v49, %v5358_v16  ;;  %v5474_v13 = vsel %vm5109_vm14, %v5473_v26, %v5472_v48 }
 0x5f7   : > { %v4998_v21 = vpop.f32.mrb[88].mxu1 }
 0x5f8   : > { %v5127_v59 = vrot.slane %v4998_v21, 2  ;;  %v5247_v62 = vrot.slane %v4998_v21, 3  ;;  %v5361_v24 = vrot.slane %v4998_v21, 4  ;;  %v5475_v63 = vrot.slane %v4998_v21, 5  ;;  %5591 = vst.msk [vmem:[%s7966_s15 + $0x158] sm:$0xf] %vm5576_vm0, %v4998_v21 }
 0x5f9   : > { %v6485_v44 = vpop.f32.mrb[89].mxu1 }
 0x5fa   : > { %v5128_v32 = vsel %vm5112_vm15, %v5127_v59, %v5126_v56  ;;  %v5248_v2 = vsel %vm5112_vm15, %v5247_v62, %v5246_v54  ;;  %v5362_v43 = vsel %vm5112_vm15, %v5361_v24, %v5360_v46  ;;  %v5476_v7 = vsel %vm5112_vm15, %v5475_v63, %v5474_v13 }
 0x5ff   : > { %v5071_v19 = vpop.f32.mrb[100].mxu0 }
 0x600   : > { %v5129_v14 = vrot.slane %v5071_v19, 1  ;;  %v5249_v42 = vrot.slane %v5071_v19, 2  ;;  %v5363_v20 = vrot.slane %v5071_v19, 3  ;;  %v5477_v41 = vrot.slane %v5071_v19, 4  ;;  %5592 = vst.msk [vmem:[%s7966_s15 + $0x170] sm:$0xf] %vm5576_vm0, %v5071_v19 }
 0x601   : > { %v6492_v61 = vpop.f32.mrb[101].mxu0 }
 0x602   : > { %v5130_v27 = vsel %vm5115_vm2, %v5129_v14, %v5128_v32  ;;  %v5250_v6 = vsel %vm5115_vm2, %v5249_v42, %v5248_v2  ;;  %v5364_v39 = vsel %vm5115_vm2, %v5363_v20, %v5362_v43  ;;  %v5478_v45 = vsel %vm5115_vm2, %v5477_v41, %v5476_v7 }
 0x603   : > { %6502 = vmatmul.mubr.msk.f32.vlgmr.msra.gmra.mrb[90].mxu1 %vm472_vm1, %v5130_v27 }
 0x604   : > { %6692 = vmatpush3.bf16.msra.mxu1 %v8132_v15  ;;  %6512 = vmatprep.mubr.msk.f32.mxu1 %vm472_vm1, %v8177_v4  ;;  %v5926_v15 = vld [vmem:[%s8314_s4 + $0x60] sm:$0xff]  ;;  %v5927_v4 = vld [vmem:[%s8314_s4 + $0x68] sm:$0xff] }
 0x605   : > { %6694 = vmatprep.subr.bf16.mxu1 %v6693_v11  ;;  %v6705_v53 = vpack.c.bf16 %v5927_v4, %v5926_v15 }
 0x608   : > { %6696 = vmatpush3.bf16.msra.mxu1 %v6693_v11 }
 0x609   : > { %6698 = vmatprep.subr.bf16.mxu1 %v6697_v17 }
 0x60b   : > { %6513 = vmatmul.mubr.msk.f32.vlgmr.msra.gmra.mrb[90].mxu1 %vm472_vm1, %v5250_v6 }
 0x60c   : > { %6700 = vmatpush3.bf16.msra.mxu1 %v6697_v17  ;;  %6523 = vmatprep.mubr.msk.f32.mxu1 %vm472_vm1, %v8180_v22  ;;  %v6903_v22 = vmov 1966171168  }
 0x60d   : > { %6702 = vmatprep.subr.bf16.mxu1 %v6701_v1  ;;  %v5597_v33 = vunpack.c.l.s4 %v6903_v22 }
 0x60f   : > { %v5598_v55 = vunpack.c.0.s8 %v5597_v33 }
 0x610   : > { %6704 = vmatpush3.bf16.msra.mxu1 %v6701_v1 }
 0x611   : > { %6706 = vmatprep.subr.bf16.mxu1 %v6705_v53  ;;  %v5601_v50 = vsub.s32 %v5598_v55, %v7419_v25 }
 0x613   : > { %6524 = vmatmul.mubr.msk.f32.vlgmr.msra.gmra.mrb[90].mxu1 %vm472_vm1, %v5364_v39 }
 0x614   : > { %6708 = vmatpush3.bf16.msra.mxu1 %v6705_v53  ;;  %6534 = vmatprep.mubr.msk.f32.mxu1 %vm472_vm1, %v8183_v29 }
 0x615   : > { %6710 = vmatprep.subr.bf16.mxu1 %v6709_v12 }
 0x618   : > { %6712 = vmatpush3.bf16.msra.mxu1 %v6709_v12 }
 0x61b   : > { %6535 = vmatmul.mubr.msk.f32.vlgmr.msra.gmra.mrb[90].mxu1 %vm472_vm1, %v5478_v45 }
 0x6ee   : > { %v6536_v28 = vpop.f32.mrb[90].mxu1 }
 0x6ef   : > { %v6717_v10 = vadd.f32 %v6536_v28, %v5913_v47  ;;  %v5549_v9 = vpop.f32.mrb[91].mxu1 }
 0x6f0   : > { %v6718_v57 = vadd.f32 %v5913_v47, %v5549_v9 }
 0x6f1   : > { %v5644_v31 = vcombine.high %v6717_v10, %v6717_v10  ;;  %v5651_v29 = vrot.slane %v6717_v10, %v5601_v50 }
 0x6f2   : > { %v5595_v35 = vcombine.high %v6718_v57, %v6718_v57  ;;  %v5602_v40 = vrot.slane %v6718_v57, %v5601_v50 }
 0x6f3   : > { %v5658_v52 = vrot.slane %v5644_v31, %v5601_v50  ;;  %v5659_v5 = vcombine.high %v5651_v29, %v5651_v29  ;;  %v5667_v38 = vrot.slane %v5651_v29, %v5601_v50 }
 0x6f4   : > { %v5609_v16 = vrot.slane %v5595_v35, %v5601_v50  ;;  %v5610_v48 = vcombine.high %v5602_v40, %v5602_v40  ;;  %v5618_v30 = vrot.slane %v5602_v40, %v5601_v50 }
 0x6f5   : > { %v5660_v25 = vcombine.high %v5658_v52, %v5658_v52  ;;  %v5674_v0 = vrot.slane %v5658_v52, %v5601_v50  ;;  %v5681_v37 = vrot.slane %v5659_v5, %v5601_v50  ;;  %v5689_v49 = vcombine.high %v5667_v38, %v5667_v38  ;;  %5718 = vst.msk [vmem:[%s7966_s15 + $0xd0] sm:$0x1] %vm5709_vm3, %v5667_v38 }
 0x6f6   : > { %v5611_v26 = vcombine.high %v5609_v16, %v5609_v16  ;;  %v5625_v3 = vrot.slane %v5609_v16, %v5601_v50  ;;  %v5632_v56 = vrot.slane %v5610_v48, %v5601_v50  ;;  %v5640_v54 = vcombine.high %v5618_v30, %v5618_v30  ;;  %5710 = vst.msk [vmem:[%s7966_s15 + $0x10] sm:$0x1] %vm5709_vm3, %v5618_v30 }
 0x6f7   : > { %v5688_v46 = vrot.slane %v5660_v25, %v5601_v50  ;;  %v5690_v13 = vcombine.high %v5674_v0, %v5674_v0  ;;  %v5691_v21 = vcombine.high %v5681_v37, %v5681_v37  ;;  %5719 = vst.msk [vmem:[%s7966_s15 + $0xe8] sm:$0x1] %vm5709_vm3, %v5681_v37  ;;  %5720 = vst.msk [vmem:[%s7966_s15 + $0x100] sm:$0x1] %vm5709_vm3, %v5689_v49 }
 0x6f8   : > { %5722 = vst.msk [vmem:[%s7966_s15 + $0x130] sm:$0x1] %vm5709_vm3, %v5674_v0  ;;  %v5639_v59 = vrot.slane %v5611_v26, %v5601_v50  ;;  %v5641_v62 = vcombine.high %v5625_v3, %v5625_v3  ;;  %v5642_v24 = vcombine.high %v5632_v56, %v5632_v56  ;;  %5711 = vst.msk [vmem:[%s7966_s15 + $0x28] sm:$0x1] %vm5709_vm3, %v5632_v56 }
 0x6f9   : > { %5712 = vst.msk [vmem:[%s7966_s15 + $0x40] sm:$0x1] %vm5709_vm3, %v5640_v54  ;;  %5714 = vst.msk [vmem:[%s7966_s15 + $0x70] sm:$0x1] %vm5709_vm3, %v5625_v3  ;;  %v5692_v63 = vcombine.high %v5688_v46, %v5688_v46 }
 0x6fa   : > { %5721 = vst.msk [vmem:[%s7966_s15 + $0x118] sm:$0x1] %vm5709_vm3, %v5691_v21  ;;  %5723 = vst.msk [vmem:[%s7966_s15 + $0x148] sm:$0x1] %vm5709_vm3, %v5688_v46  ;;  %v5643_v44 = vcombine.high %v5639_v59, %v5639_v59 }
 0x6fb   : > { %5724 = vst.msk [vmem:[%s7966_s15 + $0x160] sm:$0x1] %vm5709_vm3, %v5690_v13  ;;  %5713 = vst.msk [vmem:[%s7966_s15 + $0x58] sm:$0x1] %vm5709_vm3, %v5642_v24 }
 0x6fc   : > { %5715 = vst.msk [vmem:[%s7966_s15 + $0x88] sm:$0x1] %vm5709_vm3, %v5639_v59  ;;  %5716 = vst.msk [vmem:[%s7966_s15 + $0xa0] sm:$0x1] %vm5709_vm3, %v5641_v62 }
 0x6fd   : > { %5725 = vst.msk [vmem:[%s7966_s15 + $0x178] sm:$0x1] %vm5709_vm3, %v5692_v63  ;;  %5717 = vst.msk [vmem:[%s7966_s15 + $0xb8] sm:$0x1] %vm5709_vm3, %v5643_v44 }
 0x6fe PF: > { %s18_s27 = sadd.s32 1, %s6897_s27  }
 0x6ff   : > { %p15_p4 = scmp.ge.s32.totalorder %s18_s27, 4  }
 0x701   :  { %17 = sbr.rel (!%p15_p4) target bundleno = 1 (0x1), region = 88 }

</bundles_post_ra>
